<compile_context>
chip_gen: v7x
topology: tpu7x:2x2x1
jax: 0.10.0
libtpu: 0.0.40
codegen_flags: <defaults>
</compile_context>

<pallas_src>
import functools

import jax
import jax.numpy as jnp
from jax import lax
from jax.experimental import pallas as pl
from jax.experimental.pallas import tpu as pltpu


def _vmem_specs(n):
    return [pl.BlockSpec(memory_space=pltpu.MemorySpace.VMEM) for _ in range(n)]


# ---------------------------------------------------------------------------
# Kernel 1: ATAE-LSTM encoder (LSTM recurrence + folded no-query attention)
# ---------------------------------------------------------------------------
def _encoder_kernel(xw_ref, asp_ref,
                    wih_ref, whh_ref, b_ref, wkqh_ref,
                    out_ref, xp_ref, hs_ref,
                    *, seq_len, hidden_dim, embed_dim):
    # xw_ref  : (T, N, E) word embeddings, time-major
    # asp_ref : (N, E)    mean-pooled aspect embedding
    # LSTM    : wih (2E,4H), whh (H,4H), b (1,4H) = b_ih + b_hh  -- gate order i,f,g,o
    #           (g-gate columns pre-scaled by 2 in the wrapper: tanh(x) = 2*sigmoid(2x)-1)
    # Attn    : wkqh (1,H) = (q@Wq+bq)@Bil@Wk^T restricted to the hidden half
    #           (aspect/bias parts are per-sample constants -> cancel in the softmax)
    # out     : (N, H)
    # scratch : xp_ref (T, N, 4H) precomputed input projections, hs_ref (T, N, H)
    T, H, E = seq_len, hidden_dim, embed_dim
    N = asp_ref.shape[0]

    asp = asp_ref[...]                                   # (N, E)
    wih = wih_ref[...]                                   # (2E, 4H)
    whh = whh_ref[...]                                   # (H, 4H)
    bias = b_ref[...]                                    # (1, 4H)

    # ---- hoisted LSTM input projection (constant aspect half + all timesteps at once)
    # gates_t = [asp, x_t] @ W_ih + h @ W_hh + b
    #         = (asp @ W_ih[:E] + b) + x_t @ W_ih[E:] + h @ W_hh
    asp_pre = jnp.dot(asp, wih[:E, :],
                      preferred_element_type=jnp.float32) + bias            # (N, 4H)
    x_flat = xw_ref[...].reshape(T * N, E)                                   # (T*N, E)
    x_pre = jnp.dot(x_flat, wih[E:, :],
                    preferred_element_type=jnp.float32)                      # (T*N, 4H)
    xp_ref[...] = x_pre.reshape(T, N, 4 * H) + asp_pre[None, :, :]

    # ---- loop-invariant g-gate lane mask (hoisted out of the unrolled time loop)
    lane = lax.broadcasted_iota(jnp.int32, (N, 4 * H), 1)
    g_mask = (lane >= 2 * H) & (lane < 3 * H)

    # ---- LSTM recurrence over time (fori_loop + VMEM scratch for hidden states)
    def step(t, carry):
        h, c = carry
        gates = xp_ref[t] + jnp.dot(h, whh,
                                    preferred_element_type=jnp.float32)      # (N, 4H)
        act = jax.nn.sigmoid(gates)                       # one full-width sigmoid
        act = jnp.where(g_mask, 2.0 * act - 1.0, act)     # g lanes: tanh via sigmoid
        i_g = act[:, 0 * H:1 * H]
        f_g = act[:, 1 * H:2 * H]
        g_g = act[:, 2 * H:3 * H]
        o_g = act[:, 3 * H:4 * H]
        c = f_g * c + i_g * g_g
        h = o_g * jnp.tanh(c)
        hs_ref[t] = h
        return h, c

    init = (jnp.zeros((N, H), jnp.float32), jnp.zeros((N, H), jnp.float32))
    lax.fori_loop(0, T, step, init, unroll=True)

    # ---- attention softmax + weighted sum in one vectorized pass
    hs = hs_ref[...]                                                         # (T, N, H)
    wkq_h = wkqh_ref[...]                                                    # (1, H)
    logits = jnp.sum(hs * wkq_h[None, :, :], axis=-1, keepdims=True)         # (T, N, 1)
    m = jnp.max(logits, axis=0, keepdims=True)                               # (1, N, 1)
    p = jnp.exp(logits - m)
    denom = jnp.sum(p, axis=0, keepdims=True)
    score = p * pl.reciprocal(denom, approx=True)                            # (T, N, 1)
    out_ref[...] = jnp.sum(score * hs, axis=0)                               # (N, H)


def _pick_block_n(Np, T, E, H, budget_bytes=24 << 20):
    """Largest batch block (multiple of 8, divisor of Np) whose per-block VMEM
    (double-buffered xw + xp + hs scratch) fits the budget; once the batch is big
    enough, prefer >=2 grid programs so v7x megacore can split it."""
    divisors = [d for d in range(8, Np + 1, 8) if Np % d == 0]

    def est(bn):
        return 4 * T * bn * (2 * E + 4 * H + H)

    fitting = [d for d in divisors if est(d) <= budget_bytes]
    bn = max(fitting) if fitting else min(divisors)
    if Np // bn == 1 and Np >= 16:
        smaller = [d for d in divisors if d < Np and est(d) <= budget_bytes]
        if smaller:
            bn = max(smaller)
    return bn


def atae_encoder(text_idx, aspect_idx, params, opt, *, block_n=None):
    emb = params['embedding']                            # (V, E)
    H = opt['hidden_dim']
    E = emb.shape[-1]

    # glue: embedding gather + aspect mean-pool (padding index 0 masked, clamped)
    x = emb[text_idx]                                    # (N, T, E)
    a = emb[aspect_idx]                                  # (N, Ta, E)
    a_len = jnp.maximum(
        jnp.sum((aspect_idx != 0).astype(jnp.float32), axis=-1, keepdims=True), 1.0)
    a_pool = jnp.sum(a, axis=1) / a_len                  # (N, E)

    N, T, _ = x.shape
    xw = jnp.transpose(x, (1, 0, 2))                     # (T, N, E) time-major

    # pad batch to a sublane multiple so the in-kernel (T,N,E)<->(T*N,E) reshapes stay
    # tile-aligned (and outputs stay unmasked-store friendly)
    Np = ((N + 7) // 8) * 8
    if Np != N:
        xw = jnp.pad(xw, ((0, 0), (0, Np - N), (0, 0)))
        a_pool = jnp.pad(a_pool, ((0, Np - N), (0, 0)))

    # tanh-via-sigmoid: pre-scale the g-gate columns (i,f,g,o order) by 2
    g_scale = jnp.concatenate([jnp.ones((2 * H,), jnp.float32),
                               jnp.full((H,), 2.0, jnp.float32),
                               jnp.ones((H,), jnp.float32)])
    w_ih_s = params['w_ih'] * g_scale
    w_hh_s = params['w_hh'] * g_scale
    bias_s = (params['b_ih'] + params['b_hh']) * g_scale  # (1, 4H)

    # hoisted attention-query fold (grid-invariant): only the (1,H) vector enters VMEM.
    # att_bk / aspect terms add per-sample constants that cancel in the softmax.
    qx = jnp.dot(params['att_q'], params['att_wq']) + params['att_bq']   # (1, D)
    qw = jnp.dot(qx, params['att_bilinear'])                             # (1, D)
    wkq = jnp.dot(qw, params['att_wk'].T)                                # (1, D)
    wkq_h = wkq[:, :H]                                                   # (1, H)

    bn = _pick_block_n(Np, T, E, H) if block_n is None else block_n
    assert bn % 8 == 0 and Np % bn == 0
    grid = (Np // bn,)

    kernel = functools.partial(_encoder_kernel, seq_len=T, hidden_dim=H, embed_dim=E)

    def full(shape):
        return pl.BlockSpec(shape, lambda i, _s=shape: tuple(0 for _ in _s))

    # VMEM budget estimate (double-buffered streaming inputs/outputs + scratch + weights)
    est = 4 * (T * bn * (2 * E + 4 * H + H)
               + 2 * bn * (E + H)
               + 2 * (2 * E * 4 * H + H * 4 * H + 4 * H + H))
    cp_kwargs = dict(dimension_semantics=("parallel",))
    if est > (12 << 20):  # would not fit the smallest default scoped limit (v5e: 16 MiB)
        cp_kwargs["vmem_limit_bytes"] = int(min(max(2 * est, 32 << 20), 56 << 20))

    enc = pl.pallas_call(
        kernel,
        out_shape=jax.ShapeDtypeStruct((Np, H), jnp.float32),
        grid=grid,
        in_specs=[
            pl.BlockSpec((T, bn, E), lambda i: (0, i, 0)),   # word embeddings
            pl.BlockSpec((bn, E), lambda i: (i, 0)),         # pooled aspect
            full((2 * E, 4 * H)),                            # w_ih (g cols x2)
            full((H, 4 * H)),                                # w_hh (g cols x2)
            full((1, 4 * H)),                                # b_ih + b_hh (g cols x2)
            full((1, H)),                                    # folded attention query
        ],
        out_specs=pl.BlockSpec((bn, H), lambda i: (i, 0)),
        scratch_shapes=[
            pltpu.VMEM((T, bn, 4 * H), jnp.float32),         # precomputed input proj
            pltpu.VMEM((T, bn, H), jnp.float32),             # hidden states
        ],
        compiler_params=pltpu.CompilerParams(**cp_kwargs),
    )(xw, a_pool, w_ih_s, w_hh_s, bias_s, wkq_h)
    return enc                                             # padded (Np, H)


# ---------------------------------------------------------------------------
# Kernel 2: fused Induction (dynamic routing) + Relation (neural tensor layer)
# ---------------------------------------------------------------------------
def _induction_relation_kernel(enc_ref, indw_ref, mflat_ref,
                               relw_ref, relb_ref, out_ref,
                               *, C, K, S, H, Q, iters):
    # enc_ref  : (Np, H) padded encodings; rows [0,C*K) support, [C*K, C*K+Q) query
    # indw_ref : (H, H)   induction transform
    # mflat_ref: (H, S*H) rel_m pre-flattened: mflat[h, s*H+h'] = rel_m[s, h, h']
    # relw_ref : (S, C, C), relb_ref : (1, C)
    # out_ref  : (Q, C)   per-class probabilities
    CK = C * K
    sup = enc_ref[pl.ds(0, CK), :]                                           # (C*K, H)
    qry = enc_ref[pl.ds(CK, Q), :]                                           # (Q, H)

    # ---- Induction: dynamic routing, batched over all C classes --------------------
    e = jnp.dot(sup, indw_ref[...], preferred_element_type=jnp.float32)      # (C*K, H)
    row = lax.broadcasted_iota(jnp.int32, (C, CK), 0)
    col = lax.broadcasted_iota(jnp.int32, (C, CK), 1)
    # routing logits carried as (C, C*K): off-class entries pinned to -1e30 so they get
    # exactly zero softmax weight -> identical to per-class routing over K members.
    b = jnp.where((col // K) == row, 0.0, -1e30).astype(jnp.float32)
    cls = jnp.zeros((C, H), jnp.float32)
    for _ in range(iters):                                                   # iters small
        bm = jnp.max(b, axis=-1, keepdims=True)
        eb = jnp.exp(b - bm)
        d = eb * pl.reciprocal(jnp.sum(eb, axis=-1, keepdims=True), approx=True)
        c_hat = jnp.dot(d, e, preferred_element_type=jnp.float32)            # (C, H)
        sq = jnp.sum(c_hat * c_hat, axis=-1, keepdims=True)                  # (C, 1)
        cls = (sq * pl.reciprocal(1.0 + sq, approx=True)) \
            * lax.rsqrt(sq + 1e-9) * c_hat                                   # squash
        b = b + lax.dot_general(cls, e, (((1,), (1,)), ((), ())),
                                preferred_element_type=jnp.float32)          # (C, C*K)

    # ---- Relation: neural tensor layer ----------------------------------------------
    qm = jnp.dot(qry, mflat_ref[...],
                 preferred_element_type=jnp.float32)                         # (Q, S*H)
    acc = jnp.zeros((Q, C), jnp.float32)
    for s in range(S):
        mid = lax.dot_general(qm[:, s * H:(s + 1) * H], cls,
                              (((1,), (1,)), ((), ())),
                              preferred_element_type=jnp.float32)            # (Q, C)
        # == relu-concat(s-major) @ rel_w, expressed as a sum of block matmuls;
        #    rel_w block s fetched by leading-axis ref indexing (no row sub-slicing).
        acc = acc + jnp.dot(jnp.maximum(mid, 0.0), relw_ref[s],
                            preferred_element_type=jnp.float32)
    out_ref[...] = jax.nn.sigmoid(acc + relb_ref[...])


def induction_relation(enc_padded, num_support, num_query, params, opt):
    C = opt['num_classes']
    K = opt['num_support_per_class']
    S = opt['relation_out_size']
    H = opt['hidden_dim']
    assert num_support == C * K
    # pre-flatten rel_m (S, H, H) -> (H, S*H) and rel_w (S*C, C) -> (S, C, C) in XLA
    # (free), so the kernel's first relation stage is a single wide matmul and the
    # per-s weight block is a leading-axis ref index.
    m_flat = jnp.transpose(params['rel_m'], (1, 0, 2)).reshape(H, S * H)
    rel_w3 = params['rel_w'].reshape(S, C, C)
    kernel = functools.partial(_induction_relation_kernel,
                               C=C, K=K, S=S, H=H, Q=num_query,
                               iters=opt['iterations'])
    return pl.pallas_call(
        kernel,
        out_shape=jax.ShapeDtypeStruct((num_query, C), jnp.float32),
        in_specs=_vmem_specs(5),
        out_specs=pl.BlockSpec(memory_space=pltpu.MemorySpace.VMEM),
    )(enc_padded, params['ind_w'], m_flat, rel_w3, params['rel_b'])


# ---------------------------------------------------------------------------
# Top-level module forward
# ---------------------------------------------------------------------------
def aspect_aware_induction(x, params, opt):
    input_x, aspect_indices, num_support = x
    num_support = int(num_support)                      # x[2].item() -> static python int
    N = input_x.shape[0]
    num_query = N - num_support
    # one encoder call over support + query together (no cross-sample interaction);
    # the padded encoder output feeds the fused induction+relation kernel directly
    # (support/query split done with static ref slices inside the kernel).
    enc_padded = atae_encoder(input_x, aspect_indices, params, opt)
    return induction_relation(enc_padded, num_support, num_query, params, opt)


# ---------------------------------------------------------------------------
# Deterministic parameter init
# ---------------------------------------------------------------------------
def init_params(key, V, E, H, C, out_size):
    D = H + E
    ks = jax.random.split(key, 16)

    def uni(k, shape, s):
        return jax.random.uniform(k, shape, jnp.float32, -s, s)

    sh = 1.0 / (H ** 0.5)
    emb = jax.random.normal(ks[0], (V, E), jnp.float32) * 0.5
    emb = emb.at[0].set(0.0)                            # padding row
    return {
        'embedding': emb,
        'w_ih': uni(ks[1], (2 * E, 4 * H), sh),
        'w_hh': uni(ks[2], (H, 4 * H), sh),
        'b_ih': uni(ks[3], (1, 4 * H), sh),
        'b_hh': uni(ks[4], (1, 4 * H), sh),
        'att_wk': uni(ks[5], (D, D), 1.0 / (D ** 0.5)),
        'att_bk': uni(ks[6], (1, D), 1.0 / (D ** 0.5)),   # unused: cancels in softmax
        'att_wq': uni(ks[7], (D, D), 1.0 / (D ** 0.5)),
        'att_bq': uni(ks[8], (1, D), 1.0 / (D ** 0.5)),
        'att_q': uni(ks[9], (1, D), 1.0 / (D ** 0.5)),
        'att_bilinear': uni(ks[10], (D, D), 1.0 / (D ** 0.5)),
        'ind_w': jax.random.normal(ks[11], (H, H), jnp.float32) * 0.1,
        'rel_m': jax.random.normal(ks[12], (out_size, H, H), jnp.float32) * 0.1,
        'rel_w': jax.random.normal(ks[13], (C * out_size, C), jnp.float32) * 0.1,
        'rel_b': jax.random.normal(ks[14], (1, C), jnp.float32) * 0.1,
    }


if __name__ == "__main__":
    C, K, Q = 2, 2, 4          # 2-way 2-shot, 4 queries
    N = C * K + Q
    T, Ta = 8, 4               # sentence len, aspect len (2 real + 2 pad)
    V, E, H = 50, 32, 32       # vocab, embed_dim, hidden_dim
    out_size, iters = 8, 3

    opt = {'hidden_dim': H, 'embed_dim': E, 'num_classes': C,
           'num_support_per_class': K, 'iterations': iters,
           'relation_out_size': out_size}

    key = jax.random.PRNGKey(0)
    k_par, k_txt, k_asp = jax.random.split(key, 3)
    params = init_params(k_par, V, E, H, C, out_size)

    text_indices = jax.random.randint(k_txt, (N, T), 1, V, dtype=jnp.int32)
    asp_core = jax.random.randint(k_asp, (N, 2), 1, V, dtype=jnp.int32)
    aspect_indices = jnp.concatenate(
        [asp_core, jnp.zeros((N, Ta - 2), jnp.int32)], axis=-1)

    x = (text_indices, aspect_indices, C * K)           # (input_x, aspect_idx, num_support)
    probs = aspect_aware_induction(x, params, opt)
    probs = jax.block_until_ready(probs)
    assert probs.shape == (Q, C)
    assert bool(jnp.all(jnp.isfinite(probs)))
    print("KERNEL_OK")
</pallas_src>

<mosaic_0001>
module attributes {stable_mosaic.version = 11 : i64} {
  func.func @_encoder_kernel(%arg0: i32, %arg1: memref<8x8x32xf32, #tpu.memory_space<vmem>>, %arg2: memref<8x32xf32, #tpu.memory_space<vmem>>, %arg3: memref<64x128xf32, #tpu.memory_space<vmem>>, %arg4: memref<32x128xf32, #tpu.memory_space<vmem>>, %arg5: memref<1x128xf32, #tpu.memory_space<vmem>>, %arg6: memref<1x32xf32, #tpu.memory_space<vmem>>, %arg7: memref<8x32xf32, #tpu.memory_space<vmem>>, %arg8: memref<8x8x128xf32, #tpu.memory_space<vmem>>, %arg9: memref<8x8x32xf32, #tpu.memory_space<vmem>>) attributes {dimension_semantics = [#tpu.dimension_semantics<parallel>], iteration_bounds = array<i64: 1>, scalar_prefetch = 0 : i64, scratch_operands = 2 : i64, tpu.core_type = #tpu.core_type<tc>, window_params = [{transform_indices = @transform_0, window_bounds = array<i64: 8, 8, 32>}, {transform_indices = @transform_1, window_bounds = array<i64: 8, 32>}, {pipeline_mode = #tpu.pipeline_mode<synchronous>, transform_indices = @transform_2, window_bounds = array<i64: 64, 128>}, {pipeline_mode = #tpu.pipeline_mode<synchronous>, transform_indices = @transform_3, window_bounds = array<i64: 32, 128>}, {pipeline_mode = #tpu.pipeline_mode<synchronous>, transform_indices = @transform_4, window_bounds = array<i64: 1, 128>}, {pipeline_mode = #tpu.pipeline_mode<synchronous>, transform_indices = @transform_5, window_bounds = array<i64: 1, 32>}, {transform_indices = @transform_6, window_bounds = array<i64: 8, 32>}]} {
    %c0 = arith.constant 0 : index
    %c0_0 = arith.constant 0 : index
    %0 = vector.load %arg2[%c0, %c0_0] : memref<8x32xf32, #tpu.memory_space<vmem>>, vector<8x32xf32>
    %c0_1 = arith.constant 0 : index
    %c0_2 = arith.constant 0 : index
    %1 = vector.load %arg3[%c0_1, %c0_2] : memref<64x128xf32, #tpu.memory_space<vmem>>, vector<64x128xf32>
    %c0_3 = arith.constant 0 : index
    %c0_4 = arith.constant 0 : index
    %2 = vector.load %arg4[%c0_3, %c0_4] : memref<32x128xf32, #tpu.memory_space<vmem>>, vector<32x128xf32>
    %c0_5 = arith.constant 0 : index
    %c0_6 = arith.constant 0 : index
    %3 = vector.load %arg5[%c0_5, %c0_6] : memref<1x128xf32, #tpu.memory_space<vmem>>, vector<1x128xf32>
    %4 = vector.extract_strided_slice %1 {offsets = [0, 0], sizes = [32, 128], strides = [1, 1]} : vector<64x128xf32> to vector<32x128xf32>
    %cst = arith.constant dense<0.000000e+00> : vector<8x128xf32>
    %5 = tpu.matmul %0, %4, %cst {dimension_numbers = #tpu.dot_dimension_numbers<[1], [0], [0], [1], [0, 0, 1, 1], [], []>} : vector<8x32xf32>, vector<32x128xf32>, vector<8x128xf32> -> vector<8x128xf32>
    %6 = vector.broadcast %3 : vector<1x128xf32> to vector<8x128xf32>
    %7 = arith.addf %5, %6 : vector<8x128xf32>
    %c0_7 = arith.constant 0 : index
    %c0_8 = arith.constant 0 : index
    %c0_9 = arith.constant 0 : index
    %8 = vector.load %arg1[%c0_7, %c0_8, %c0_9] : memref<8x8x32xf32, #tpu.memory_space<vmem>>, vector<8x8x32xf32>
    %9 = vector.shape_cast %8 : vector<8x8x32xf32> to vector<64x32xf32>
    %10 = vector.extract_strided_slice %1 {offsets = [32, 0], sizes = [32, 128], strides = [1, 1]} : vector<64x128xf32> to vector<32x128xf32>
    %cst_10 = arith.constant dense<0.000000e+00> : vector<64x128xf32>
    %11 = tpu.matmul %9, %10, %cst_10 {dimension_numbers = #tpu.dot_dimension_numbers<[1], [0], [0], [1], [0, 0, 1, 1], [], []>} : vector<64x32xf32>, vector<32x128xf32>, vector<64x128xf32> -> vector<64x128xf32>
    %12 = vector.shape_cast %11 : vector<64x128xf32> to vector<8x8x128xf32>
    %13 = vector.shape_cast %7 : vector<8x128xf32> to vector<1x8x128xf32>
    %14 = vector.broadcast %13 : vector<1x8x128xf32> to vector<8x8x128xf32>
    %15 = arith.addf %12, %14 : vector<8x8x128xf32>
    %c0_11 = arith.constant 0 : index
    %c0_12 = arith.constant 0 : index
    %c0_13 = arith.constant 0 : index
    %16 = vector.load %arg8[%c0_11, %c0_12, %c0_13] : memref<8x8x128xf32, #tpu.memory_space<vmem>>, vector<8x8x128xf32>
    tpu.vector_store %arg8[%c0_11, %c0_12, %c0_13], %15 {strides = array<i32>} : memref<8x8x128xf32, #tpu.memory_space<vmem>>, vector<8x8x128xf32>,
    %17 = tpu.iota {dimensions = array<i32: 1>} : vector<8x128xi32>
    %c64_i32 = arith.constant 64 : i32
    %18 = vector.broadcast %c64_i32 : i32 to vector<8x128xi32>
    %19 = arith.cmpi sge, %17, %18 : vector<8x128xi32>
    %c96_i32 = arith.constant 96 : i32
    %20 = vector.broadcast %c96_i32 : i32 to vector<8x128xi32>
    %21 = arith.cmpi slt, %17, %20 : vector<8x128xi32>
    %22 = arith.andi %19, %21 : vector<8x128xi1>
    %cst_14 = arith.constant 0.000000e+00 : f32
    %23 = vector.broadcast %cst_14 : f32 to vector<8x32xf32>
    %cst_15 = arith.constant 0.000000e+00 : f32
    %24 = vector.broadcast %cst_15 : f32 to vector<8x32xf32>
    %c0_i32 = arith.constant 0 : i32
    %25 = arith.index_cast %c0_i32 : i32 to index
    %c0_16 = arith.constant 0 : index
    %c0_17 = arith.constant 0 : index
    %26 = vector.load %arg8[%25, %c0_16, %c0_17] : memref<8x8x128xf32, #tpu.memory_space<vmem>>, vector<1x8x128xf32>
    %27 = vector.shape_cast %26 : vector<1x8x128xf32> to vector<8x128xf32>
    %cst_18 = arith.constant dense<0.000000e+00> : vector<8x128xf32>
    %28 = tpu.matmul %23, %2, %cst_18 {dimension_numbers = #tpu.dot_dimension_numbers<[1], [0], [0], [1], [0, 0, 1, 1], [], []>} : vector<8x32xf32>, vector<32x128xf32>, vector<8x128xf32> -> vector<8x128xf32>
    %29 = arith.addf %27, %28 : vector<8x128xf32>
    %30 = arith.negf %29 : vector<8x128xf32>
    %31 = math.exp %30 : vector<8x128xf32>
    %cst_19 = arith.constant 1.000000e+00 : f32
    %32 = vector.broadcast %cst_19 : f32 to vector<8x128xf32>
    %33 = arith.addf %32, %31 : vector<8x128xf32>
    %34 = arith.divf %32, %33 : vector<8x128xf32>
    %cst_20 = arith.constant 2.000000e+00 : f32
    %35 = vector.broadcast %cst_20 : f32 to vector<8x128xf32>
    %36 = arith.mulf %35, %34 : vector<8x128xf32>
    %cst_21 = arith.constant 1.000000e+00 : f32
    %37 = vector.broadcast %cst_21 : f32 to vector<8x128xf32>
    %38 = arith.subf %36, %37 : vector<8x128xf32>
    %39 = arith.select %22, %38, %34 : vector<8x128xi1>, vector<8x128xf32>
    %40 = vector.extract_strided_slice %39 {offsets = [0, 0], sizes = [8, 32], strides = [1, 1]} : vector<8x128xf32> to vector<8x32xf32>
    %41 = vector.extract_strided_slice %39 {offsets = [0, 32], sizes = [8, 32], strides = [1, 1]} : vector<8x128xf32> to vector<8x32xf32>
    %42 = vector.extract_strided_slice %39 {offsets = [0, 64], sizes = [8, 32], strides = [1, 1]} : vector<8x128xf32> to vector<8x32xf32>
    %43 = vector.extract_strided_slice %39 {offsets = [0, 96], sizes = [8, 32], strides = [1, 1]} : vector<8x128xf32> to vector<8x32xf32>
    %44 = arith.mulf %41, %24 : vector<8x32xf32>
    %45 = arith.mulf %40, %42 : vector<8x32xf32>
    %46 = arith.addf %44, %45 : vector<8x32xf32>
    %47 = math.tanh %46 : vector<8x32xf32>
    %48 = arith.mulf %43, %47 : vector<8x32xf32>
    %49 = arith.index_cast %c0_i32 : i32 to index
    %c0_22 = arith.constant 0 : index
    %c0_23 = arith.constant 0 : index
    %50 = vector.load %arg9[%49, %c0_22, %c0_23] : memref<8x8x32xf32, #tpu.memory_space<vmem>>, vector<1x8x32xf32>
    %51 = vector.shape_cast %50 : vector<1x8x32xf32> to vector<8x32xf32>
    %52 = vector.shape_cast %48 : vector<8x32xf32> to vector<1x8x32xf32>
    tpu.vector_store %arg9[%49, %c0_22, %c0_23], %52 {strides = array<i32>} : memref<8x8x32xf32, #tpu.memory_space<vmem>>, vector<1x8x32xf32>,
    %c1_i32 = arith.constant 1 : i32
    %53 = arith.index_cast %c1_i32 : i32 to index
    %c0_24 = arith.constant 0 : index
    %c0_25 = arith.constant 0 : index
    %54 = vector.load %arg8[%53, %c0_24, %c0_25] : memref<8x8x128xf32, #tpu.memory_space<vmem>>, vector<1x8x128xf32>
    %55 = vector.shape_cast %54 : vector<1x8x128xf32> to vector<8x128xf32>
    %cst_26 = arith.constant dense<0.000000e+00> : vector<8x128xf32>
    %56 = tpu.matmul %48, %2, %cst_26 {dimension_numbers = #tpu.dot_dimension_numbers<[1], [0], [0], [1], [0, 0, 1, 1], [], []>} : vector<8x32xf32>, vector<32x128xf32>, vector<8x128xf32> -> vector<8x128xf32>
    %57 = arith.addf %55, %56 : vector<8x128xf32>
    %58 = arith.negf %57 : vector<8x128xf32>
    %59 = math.exp %58 : vector<8x128xf32>
    %cst_27 = arith.constant 1.000000e+00 : f32
    %60 = vector.broadcast %cst_27 : f32 to vector<8x128xf32>
    %61 = arith.addf %60, %59 : vector<8x128xf32>
    %62 = arith.divf %60, %61 : vector<8x128xf32>
    %cst_28 = arith.constant 2.000000e+00 : f32
    %63 = vector.broadcast %cst_28 : f32 to vector<8x128xf32>
    %64 = arith.mulf %63, %62 : vector<8x128xf32>
    %cst_29 = arith.constant 1.000000e+00 : f32
    %65 = vector.broadcast %cst_29 : f32 to vector<8x128xf32>
    %66 = arith.subf %64, %65 : vector<8x128xf32>
    %67 = arith.select %22, %66, %62 : vector<8x128xi1>, vector<8x128xf32>
    %68 = vector.extract_strided_slice %67 {offsets = [0, 0], sizes = [8, 32], strides = [1, 1]} : vector<8x128xf32> to vector<8x32xf32>
    %69 = vector.extract_strided_slice %67 {offsets = [0, 32], sizes = [8, 32], strides = [1, 1]} : vector<8x128xf32> to vector<8x32xf32>
    %70 = vector.extract_strided_slice %67 {offsets = [0, 64], sizes = [8, 32], strides = [1, 1]} : vector<8x128xf32> to vector<8x32xf32>
    %71 = vector.extract_strided_slice %67 {offsets = [0, 96], sizes = [8, 32], strides = [1, 1]} : vector<8x128xf32> to vector<8x32xf32>
    %72 = arith.mulf %69, %46 : vector<8x32xf32>
    %73 = arith.mulf %68, %70 : vector<8x32xf32>
    %74 = arith.addf %72, %73 : vector<8x32xf32>
    %75 = math.tanh %74 : vector<8x32xf32>
    %76 = arith.mulf %71, %75 : vector<8x32xf32>
    %77 = arith.index_cast %c1_i32 : i32 to index
    %c0_30 = arith.constant 0 : index
    %c0_31 = arith.constant 0 : index
    %78 = vector.load %arg9[%77, %c0_30, %c0_31] : memref<8x8x32xf32, #tpu.memory_space<vmem>>, vector<1x8x32xf32>
    %79 = vector.shape_cast %78 : vector<1x8x32xf32> to vector<8x32xf32>
    %80 = vector.shape_cast %76 : vector<8x32xf32> to vector<1x8x32xf32>
    tpu.vector_store %arg9[%77, %c0_30, %c0_31], %80 {strides = array<i32>} : memref<8x8x32xf32, #tpu.memory_space<vmem>>, vector<1x8x32xf32>,
    %c2_i32 = arith.constant 2 : i32
    %81 = arith.index_cast %c2_i32 : i32 to index
    %c0_32 = arith.constant 0 : index
    %c0_33 = arith.constant 0 : index
    %82 = vector.load %arg8[%81, %c0_32, %c0_33] : memref<8x8x128xf32, #tpu.memory_space<vmem>>, vector<1x8x128xf32>
    %83 = vector.shape_cast %82 : vector<1x8x128xf32> to vector<8x128xf32>
    %cst_34 = arith.constant dense<0.000000e+00> : vector<8x128xf32>
    %84 = tpu.matmul %76, %2, %cst_34 {dimension_numbers = #tpu.dot_dimension_numbers<[1], [0], [0], [1], [0, 0, 1, 1], [], []>} : vector<8x32xf32>, vector<32x128xf32>, vector<8x128xf32> -> vector<8x128xf32>
    %85 = arith.addf %83, %84 : vector<8x128xf32>
    %86 = arith.negf %85 : vector<8x128xf32>
    %87 = math.exp %86 : vector<8x128xf32>
    %cst_35 = arith.constant 1.000000e+00 : f32
    %88 = vector.broadcast %cst_35 : f32 to vector<8x128xf32>
    %89 = arith.addf %88, %87 : vector<8x128xf32>
    %90 = arith.divf %88, %89 : vector<8x128xf32>
    %cst_36 = arith.constant 2.000000e+00 : f32
    %91 = vector.broadcast %cst_36 : f32 to vector<8x128xf32>
    %92 = arith.mulf %91, %90 : vector<8x128xf32>
    %cst_37 = arith.constant 1.000000e+00 : f32
    %93 = vector.broadcast %cst_37 : f32 to vector<8x128xf32>
    %94 = arith.subf %92, %93 : vector<8x128xf32>
    %95 = arith.select %22, %94, %90 : vector<8x128xi1>, vector<8x128xf32>
    %96 = vector.extract_strided_slice %95 {offsets = [0, 0], sizes = [8, 32], strides = [1, 1]} : vector<8x128xf32> to vector<8x32xf32>
    %97 = vector.extract_strided_slice %95 {offsets = [0, 32], sizes = [8, 32], strides = [1, 1]} : vector<8x128xf32> to vector<8x32xf32>
    %98 = vector.extract_strided_slice %95 {offsets = [0, 64], sizes = [8, 32], strides = [1, 1]} : vector<8x128xf32> to vector<8x32xf32>
    %99 = vector.extract_strided_slice %95 {offsets = [0, 96], sizes = [8, 32], strides = [1, 1]} : vector<8x128xf32> to vector<8x32xf32>
    %100 = arith.mulf %97, %74 : vector<8x32xf32>
    %101 = arith.mulf %96, %98 : vector<8x32xf32>
    %102 = arith.addf %100, %101 : vector<8x32xf32>
    %103 = math.tanh %102 : vector<8x32xf32>
    %104 = arith.mulf %99, %103 : vector<8x32xf32>
    %105 = arith.index_cast %c2_i32 : i32 to index
    %c0_38 = arith.constant 0 : index
    %c0_39 = arith.constant 0 : index
    %106 = vector.load %arg9[%105, %c0_38, %c0_39] : memref<8x8x32xf32, #tpu.memory_space<vmem>>, vector<1x8x32xf32>
    %107 = vector.shape_cast %106 : vector<1x8x32xf32> to vector<8x32xf32>
    %108 = vector.shape_cast %104 : vector<8x32xf32> to vector<1x8x32xf32>
    tpu.vector_store %arg9[%105, %c0_38, %c0_39], %108 {strides = array<i32>} : memref<8x8x32xf32, #tpu.memory_space<vmem>>, vector<1x8x32xf32>,
    %c3_i32 = arith.constant 3 : i32
    %109 = arith.index_cast %c3_i32 : i32 to index
    %c0_40 = arith.constant 0 : index
    %c0_41 = arith.constant 0 : index
    %110 = vector.load %arg8[%109, %c0_40, %c0_41] : memref<8x8x128xf32, #tpu.memory_space<vmem>>, vector<1x8x128xf32>
    %111 = vector.shape_cast %110 : vector<1x8x128xf32> to vector<8x128xf32>
    %cst_42 = arith.constant dense<0.000000e+00> : vector<8x128xf32>
    %112 = tpu.matmul %104, %2, %cst_42 {dimension_numbers = #tpu.dot_dimension_numbers<[1], [0], [0], [1], [0, 0, 1, 1], [], []>} : vector<8x32xf32>, vector<32x128xf32>, vector<8x128xf32> -> vector<8x128xf32>
    %113 = arith.addf %111, %112 : vector<8x128xf32>
    %114 = arith.negf %113 : vector<8x128xf32>
    %115 = math.exp %114 : vector<8x128xf32>
    %cst_43 = arith.constant 1.000000e+00 : f32
    %116 = vector.broadcast %cst_43 : f32 to vector<8x128xf32>
    %117 = arith.addf %116, %115 : vector<8x128xf32>
    %118 = arith.divf %116, %117 : vector<8x128xf32>
    %cst_44 = arith.constant 2.000000e+00 : f32
    %119 = vector.broadcast %cst_44 : f32 to vector<8x128xf32>
    %120 = arith.mulf %119, %118 : vector<8x128xf32>
    %cst_45 = arith.constant 1.000000e+00 : f32
    %121 = vector.broadcast %cst_45 : f32 to vector<8x128xf32>
    %122 = arith.subf %120, %121 : vector<8x128xf32>
    %123 = arith.select %22, %122, %118 : vector<8x128xi1>, vector<8x128xf32>
    %124 = vector.extract_strided_slice %123 {offsets = [0, 0], sizes = [8, 32], strides = [1, 1]} : vector<8x128xf32> to vector<8x32xf32>
    %125 = vector.extract_strided_slice %123 {offsets = [0, 32], sizes = [8, 32], strides = [1, 1]} : vector<8x128xf32> to vector<8x32xf32>
    %126 = vector.extract_strided_slice %123 {offsets = [0, 64], sizes = [8, 32], strides = [1, 1]} : vector<8x128xf32> to vector<8x32xf32>
    %127 = vector.extract_strided_slice %123 {offsets = [0, 96], sizes = [8, 32], strides = [1, 1]} : vector<8x128xf32> to vector<8x32xf32>
    %128 = arith.mulf %125, %102 : vector<8x32xf32>
    %129 = arith.mulf %124, %126 : vector<8x32xf32>
    %130 = arith.addf %128, %129 : vector<8x32xf32>
    %131 = math.tanh %130 : vector<8x32xf32>
    %132 = arith.mulf %127, %131 : vector<8x32xf32>
    %133 = arith.index_cast %c3_i32 : i32 to index
    %c0_46 = arith.constant 0 : index
    %c0_47 = arith.constant 0 : index
    %134 = vector.load %arg9[%133, %c0_46, %c0_47] : memref<8x8x32xf32, #tpu.memory_space<vmem>>, vector<1x8x32xf32>
    %135 = vector.shape_cast %134 : vector<1x8x32xf32> to vector<8x32xf32>
    %136 = vector.shape_cast %132 : vector<8x32xf32> to vector<1x8x32xf32>
    tpu.vector_store %arg9[%133, %c0_46, %c0_47], %136 {strides = array<i32>} : memref<8x8x32xf32, #tpu.memory_space<vmem>>, vector<1x8x32xf32>,
    %c4_i32 = arith.constant 4 : i32
    %137 = arith.index_cast %c4_i32 : i32 to index
    %c0_48 = arith.constant 0 : index
    %c0_49 = arith.constant 0 : index
    %138 = vector.load %arg8[%137, %c0_48, %c0_49] : memref<8x8x128xf32, #tpu.memory_space<vmem>>, vector<1x8x128xf32>
    %139 = vector.shape_cast %138 : vector<1x8x128xf32> to vector<8x128xf32>
    %cst_50 = arith.constant dense<0.000000e+00> : vector<8x128xf32>
    %140 = tpu.matmul %132, %2, %cst_50 {dimension_numbers = #tpu.dot_dimension_numbers<[1], [0], [0], [1], [0, 0, 1, 1], [], []>} : vector<8x32xf32>, vector<32x128xf32>, vector<8x128xf32> -> vector<8x128xf32>
    %141 = arith.addf %139, %140 : vector<8x128xf32>
    %142 = arith.negf %141 : vector<8x128xf32>
    %143 = math.exp %142 : vector<8x128xf32>
    %cst_51 = arith.constant 1.000000e+00 : f32
    %144 = vector.broadcast %cst_51 : f32 to vector<8x128xf32>
    %145 = arith.addf %144, %143 : vector<8x128xf32>
    %146 = arith.divf %144, %145 : vector<8x128xf32>
    %cst_52 = arith.constant 2.000000e+00 : f32
    %147 = vector.broadcast %cst_52 : f32 to vector<8x128xf32>
    %148 = arith.mulf %147, %146 : vector<8x128xf32>
    %cst_53 = arith.constant 1.000000e+00 : f32
    %149 = vector.broadcast %cst_53 : f32 to vector<8x128xf32>
    %150 = arith.subf %148, %149 : vector<8x128xf32>
    %151 = arith.select %22, %150, %146 : vector<8x128xi1>, vector<8x128xf32>
    %152 = vector.extract_strided_slice %151 {offsets = [0, 0], sizes = [8, 32], strides = [1, 1]} : vector<8x128xf32> to vector<8x32xf32>
    %153 = vector.extract_strided_slice %151 {offsets = [0, 32], sizes = [8, 32], strides = [1, 1]} : vector<8x128xf32> to vector<8x32xf32>
    %154 = vector.extract_strided_slice %151 {offsets = [0, 64], sizes = [8, 32], strides = [1, 1]} : vector<8x128xf32> to vector<8x32xf32>
    %155 = vector.extract_strided_slice %151 {offsets = [0, 96], sizes = [8, 32], strides = [1, 1]} : vector<8x128xf32> to vector<8x32xf32>
    %156 = arith.mulf %153, %130 : vector<8x32xf32>
    %157 = arith.mulf %152, %154 : vector<8x32xf32>
    %158 = arith.addf %156, %157 : vector<8x32xf32>
    %159 = math.tanh %158 : vector<8x32xf32>
    %160 = arith.mulf %155, %159 : vector<8x32xf32>
    %161 = arith.index_cast %c4_i32 : i32 to index
    %c0_54 = arith.constant 0 : index
    %c0_55 = arith.constant 0 : index
    %162 = vector.load %arg9[%161, %c0_54, %c0_55] : memref<8x8x32xf32, #tpu.memory_space<vmem>>, vector<1x8x32xf32>
    %163 = vector.shape_cast %162 : vector<1x8x32xf32> to vector<8x32xf32>
    %164 = vector.shape_cast %160 : vector<8x32xf32> to vector<1x8x32xf32>
    tpu.vector_store %arg9[%161, %c0_54, %c0_55], %164 {strides = array<i32>} : memref<8x8x32xf32, #tpu.memory_space<vmem>>, vector<1x8x32xf32>,
    %c5_i32 = arith.constant 5 : i32
    %165 = arith.index_cast %c5_i32 : i32 to index
    %c0_56 = arith.constant 0 : index
    %c0_57 = arith.constant 0 : index
    %166 = vector.load %arg8[%165, %c0_56, %c0_57] : memref<8x8x128xf32, #tpu.memory_space<vmem>>, vector<1x8x128xf32>
    %167 = vector.shape_cast %166 : vector<1x8x128xf32> to vector<8x128xf32>
    %cst_58 = arith.constant dense<0.000000e+00> : vector<8x128xf32>
    %168 = tpu.matmul %160, %2, %cst_58 {dimension_numbers = #tpu.dot_dimension_numbers<[1], [0], [0], [1], [0, 0, 1, 1], [], []>} : vector<8x32xf32>, vector<32x128xf32>, vector<8x128xf32> -> vector<8x128xf32>
    %169 = arith.addf %167, %168 : vector<8x128xf32>
    %170 = arith.negf %169 : vector<8x128xf32>
    %171 = math.exp %170 : vector<8x128xf32>
    %cst_59 = arith.constant 1.000000e+00 : f32
    %172 = vector.broadcast %cst_59 : f32 to vector<8x128xf32>
    %173 = arith.addf %172, %171 : vector<8x128xf32>
    %174 = arith.divf %172, %173 : vector<8x128xf32>
    %cst_60 = arith.constant 2.000000e+00 : f32
    %175 = vector.broadcast %cst_60 : f32 to vector<8x128xf32>
    %176 = arith.mulf %175, %174 : vector<8x128xf32>
    %cst_61 = arith.constant 1.000000e+00 : f32
    %177 = vector.broadcast %cst_61 : f32 to vector<8x128xf32>
    %178 = arith.subf %176, %177 : vector<8x128xf32>
    %179 = arith.select %22, %178, %174 : vector<8x128xi1>, vector<8x128xf32>
    %180 = vector.extract_strided_slice %179 {offsets = [0, 0], sizes = [8, 32], strides = [1, 1]} : vector<8x128xf32> to vector<8x32xf32>
    %181 = vector.extract_strided_slice %179 {offsets = [0, 32], sizes = [8, 32], strides = [1, 1]} : vector<8x128xf32> to vector<8x32xf32>
    %182 = vector.extract_strided_slice %179 {offsets = [0, 64], sizes = [8, 32], strides = [1, 1]} : vector<8x128xf32> to vector<8x32xf32>
    %183 = vector.extract_strided_slice %179 {offsets = [0, 96], sizes = [8, 32], strides = [1, 1]} : vector<8x128xf32> to vector<8x32xf32>
    %184 = arith.mulf %181, %158 : vector<8x32xf32>
    %185 = arith.mulf %180, %182 : vector<8x32xf32>
    %186 = arith.addf %184, %185 : vector<8x32xf32>
    %187 = math.tanh %186 : vector<8x32xf32>
    %188 = arith.mulf %183, %187 : vector<8x32xf32>
    %189 = arith.index_cast %c5_i32 : i32 to index
    %c0_62 = arith.constant 0 : index
    %c0_63 = arith.constant 0 : index
    %190 = vector.load %arg9[%189, %c0_62, %c0_63] : memref<8x8x32xf32, #tpu.memory_space<vmem>>, vector<1x8x32xf32>
    %191 = vector.shape_cast %190 : vector<1x8x32xf32> to vector<8x32xf32>
    %192 = vector.shape_cast %188 : vector<8x32xf32> to vector<1x8x32xf32>
    tpu.vector_store %arg9[%189, %c0_62, %c0_63], %192 {strides = array<i32>} : memref<8x8x32xf32, #tpu.memory_space<vmem>>, vector<1x8x32xf32>,
    %c6_i32 = arith.constant 6 : i32
    %193 = arith.index_cast %c6_i32 : i32 to index
    %c0_64 = arith.constant 0 : index
    %c0_65 = arith.constant 0 : index
    %194 = vector.load %arg8[%193, %c0_64, %c0_65] : memref<8x8x128xf32, #tpu.memory_space<vmem>>, vector<1x8x128xf32>
    %195 = vector.shape_cast %194 : vector<1x8x128xf32> to vector<8x128xf32>
    %cst_66 = arith.constant dense<0.000000e+00> : vector<8x128xf32>
    %196 = tpu.matmul %188, %2, %cst_66 {dimension_numbers = #tpu.dot_dimension_numbers<[1], [0], [0], [1], [0, 0, 1, 1], [], []>} : vector<8x32xf32>, vector<32x128xf32>, vector<8x128xf32> -> vector<8x128xf32>
    %197 = arith.addf %195, %196 : vector<8x128xf32>
    %198 = arith.negf %197 : vector<8x128xf32>
    %199 = math.exp %198 : vector<8x128xf32>
    %cst_67 = arith.constant 1.000000e+00 : f32
    %200 = vector.broadcast %cst_67 : f32 to vector<8x128xf32>
    %201 = arith.addf %200, %199 : vector<8x128xf32>
    %202 = arith.divf %200, %201 : vector<8x128xf32>
    %cst_68 = arith.constant 2.000000e+00 : f32
    %203 = vector.broadcast %cst_68 : f32 to vector<8x128xf32>
    %204 = arith.mulf %203, %202 : vector<8x128xf32>
    %cst_69 = arith.constant 1.000000e+00 : f32
    %205 = vector.broadcast %cst_69 : f32 to vector<8x128xf32>
    %206 = arith.subf %204, %205 : vector<8x128xf32>
    %207 = arith.select %22, %206, %202 : vector<8x128xi1>, vector<8x128xf32>
    %208 = vector.extract_strided_slice %207 {offsets = [0, 0], sizes = [8, 32], strides = [1, 1]} : vector<8x128xf32> to vector<8x32xf32>
    %209 = vector.extract_strided_slice %207 {offsets = [0, 32], sizes = [8, 32], strides = [1, 1]} : vector<8x128xf32> to vector<8x32xf32>
    %210 = vector.extract_strided_slice %207 {offsets = [0, 64], sizes = [8, 32], strides = [1, 1]} : vector<8x128xf32> to vector<8x32xf32>
    %211 = vector.extract_strided_slice %207 {offsets = [0, 96], sizes = [8, 32], strides = [1, 1]} : vector<8x128xf32> to vector<8x32xf32>
    %212 = arith.mulf %209, %186 : vector<8x32xf32>
    %213 = arith.mulf %208, %210 : vector<8x32xf32>
    %214 = arith.addf %212, %213 : vector<8x32xf32>
    %215 = math.tanh %214 : vector<8x32xf32>
    %216 = arith.mulf %211, %215 : vector<8x32xf32>
    %217 = arith.index_cast %c6_i32 : i32 to index
    %c0_70 = arith.constant 0 : index
    %c0_71 = arith.constant 0 : index
    %218 = vector.load %arg9[%217, %c0_70, %c0_71] : memref<8x8x32xf32, #tpu.memory_space<vmem>>, vector<1x8x32xf32>
    %219 = vector.shape_cast %218 : vector<1x8x32xf32> to vector<8x32xf32>
    %220 = vector.shape_cast %216 : vector<8x32xf32> to vector<1x8x32xf32>
    tpu.vector_store %arg9[%217, %c0_70, %c0_71], %220 {strides = array<i32>} : memref<8x8x32xf32, #tpu.memory_space<vmem>>, vector<1x8x32xf32>,
    %c7_i32 = arith.constant 7 : i32
    %221 = arith.index_cast %c7_i32 : i32 to index
    %c0_72 = arith.constant 0 : index
    %c0_73 = arith.constant 0 : index
    %222 = vector.load %arg8[%221, %c0_72, %c0_73] : memref<8x8x128xf32, #tpu.memory_space<vmem>>, vector<1x8x128xf32>
    %223 = vector.shape_cast %222 : vector<1x8x128xf32> to vector<8x128xf32>
    %cst_74 = arith.constant dense<0.000000e+00> : vector<8x128xf32>
    %224 = tpu.matmul %216, %2, %cst_74 {dimension_numbers = #tpu.dot_dimension_numbers<[1], [0], [0], [1], [0, 0, 1, 1], [], []>} : vector<8x32xf32>, vector<32x128xf32>, vector<8x128xf32> -> vector<8x128xf32>
    %225 = arith.addf %223, %224 : vector<8x128xf32>
    %226 = arith.negf %225 : vector<8x128xf32>
    %227 = math.exp %226 : vector<8x128xf32>
    %cst_75 = arith.constant 1.000000e+00 : f32
    %228 = vector.broadcast %cst_75 : f32 to vector<8x128xf32>
    %229 = arith.addf %228, %227 : vector<8x128xf32>
    %230 = arith.divf %228, %229 : vector<8x128xf32>
    %cst_76 = arith.constant 2.000000e+00 : f32
    %231 = vector.broadcast %cst_76 : f32 to vector<8x128xf32>
    %232 = arith.mulf %231, %230 : vector<8x128xf32>
    %cst_77 = arith.constant 1.000000e+00 : f32
    %233 = vector.broadcast %cst_77 : f32 to vector<8x128xf32>
    %234 = arith.subf %232, %233 : vector<8x128xf32>
    %235 = arith.select %22, %234, %230 : vector<8x128xi1>, vector<8x128xf32>
    %236 = vector.extract_strided_slice %235 {offsets = [0, 0], sizes = [8, 32], strides = [1, 1]} : vector<8x128xf32> to vector<8x32xf32>
    %237 = vector.extract_strided_slice %235 {offsets = [0, 32], sizes = [8, 32], strides = [1, 1]} : vector<8x128xf32> to vector<8x32xf32>
    %238 = vector.extract_strided_slice %235 {offsets = [0, 64], sizes = [8, 32], strides = [1, 1]} : vector<8x128xf32> to vector<8x32xf32>
    %239 = vector.extract_strided_slice %235 {offsets = [0, 96], sizes = [8, 32], strides = [1, 1]} : vector<8x128xf32> to vector<8x32xf32>
    %240 = arith.mulf %237, %214 : vector<8x32xf32>
    %241 = arith.mulf %236, %238 : vector<8x32xf32>
    %242 = arith.addf %240, %241 : vector<8x32xf32>
    %243 = math.tanh %242 : vector<8x32xf32>
    %244 = arith.mulf %239, %243 : vector<8x32xf32>
    %245 = arith.index_cast %c7_i32 : i32 to index
    %c0_78 = arith.constant 0 : index
    %c0_79 = arith.constant 0 : index
    %246 = vector.load %arg9[%245, %c0_78, %c0_79] : memref<8x8x32xf32, #tpu.memory_space<vmem>>, vector<1x8x32xf32>
    %247 = vector.shape_cast %246 : vector<1x8x32xf32> to vector<8x32xf32>
    %248 = vector.shape_cast %244 : vector<8x32xf32> to vector<1x8x32xf32>
    tpu.vector_store %arg9[%245, %c0_78, %c0_79], %248 {strides = array<i32>} : memref<8x8x32xf32, #tpu.memory_space<vmem>>, vector<1x8x32xf32>,
    %c8_i32 = arith.constant 8 : i32
    %c0_80 = arith.constant 0 : index
    %c0_81 = arith.constant 0 : index
    %c0_82 = arith.constant 0 : index
    %249 = vector.load %arg9[%c0_80, %c0_81, %c0_82] : memref<8x8x32xf32, #tpu.memory_space<vmem>>, vector<8x8x32xf32>
    %c0_83 = arith.constant 0 : index
    %c0_84 = arith.constant 0 : index
    %250 = vector.load %arg6[%c0_83, %c0_84] : memref<1x32xf32, #tpu.memory_space<vmem>>, vector<1x32xf32>
    %251 = vector.shape_cast %250 : vector<1x32xf32> to vector<1x1x32xf32>
    %252 = vector.broadcast %251 : vector<1x1x32xf32> to vector<8x8x32xf32>
    %253 = arith.mulf %249, %252 : vector<8x8x32xf32>
    %cst_85 = arith.constant dense<0.000000e+00> : vector<8x8xf32>
    %254 = vector.multi_reduction <add>, %253, %cst_85 [2] : vector<8x8x32xf32> to vector<8x8xf32>
    %255 = vector.shape_cast %254 : vector<8x8xf32> to vector<8x8x1xf32>
    %cst_86 = arith.constant dense<0xFF800000> : vector<8x1xf32>
    %256 = vector.multi_reduction <maximumf>, %255, %cst_86 [0] : vector<8x8x1xf32> to vector<8x1xf32>
    %257 = vector.shape_cast %256 : vector<8x1xf32> to vector<1x8x1xf32>
    %258 = vector.broadcast %257 : vector<1x8x1xf32> to vector<8x8x1xf32>
    %259 = arith.subf %255, %258 : vector<8x8x1xf32>
    %260 = math.exp %259 : vector<8x8x1xf32>
    %cst_87 = arith.constant dense<0.000000e+00> : vector<8x1xf32>
    %261 = vector.multi_reduction <add>, %260, %cst_87 [0] : vector<8x8x1xf32> to vector<8x1xf32>
    %262 = vector.shape_cast %261 : vector<8x1xf32> to vector<1x8x1xf32>
    %263 = tpu.reciprocal %262 {approx = true} : vector<1x8x1xf32> -> vector<1x8x1xf32>
    %264 = vector.broadcast %263 : vector<1x8x1xf32> to vector<8x8x1xf32>
    %265 = arith.mulf %260, %264 : vector<8x8x1xf32>
    %266 = vector.broadcast %265 : vector<8x8x1xf32> to vector<8x8x32xf32>
    %267 = arith.mulf %266, %249 : vector<8x8x32xf32>
    %cst_88 = arith.constant dense<0.000000e+00> : vector<8x32xf32>
    %268 = vector.multi_reduction <add>, %267, %cst_88 [0] : vector<8x8x32xf32> to vector<8x32xf32>
    %c0_89 = arith.constant 0 : index
    %c0_90 = arith.constant 0 : index
    %269 = vector.load %arg7[%c0_89, %c0_90] : memref<8x32xf32, #tpu.memory_space<vmem>>, vector<8x32xf32>
    tpu.vector_store %arg7[%c0_89, %c0_90], %268 {strides = array<i32>} : memref<8x32xf32, #tpu.memory_space<vmem>>, vector<8x32xf32>,
    return
  }
  func.func @transform_0(%arg0: i32) -> (i32, i32, i32) {
    %c0_i32 = arith.constant 0 : i32
    %c0_i32_0 = arith.constant 0 : i32
    %c0_i32_1 = arith.constant 0 : i32
    return %c0_i32, %arg0, %c0_i32_0 : i32, i32, i32
  }
  func.func @transform_1(%arg0: i32) -> (i32, i32) {
    %c0_i32 = arith.constant 0 : i32
    %c0_i32_0 = arith.constant 0 : i32
    return %arg0, %c0_i32 : i32, i32
  }
  func.func @transform_2(%arg0: i32) -> (i32, i32) {
    %c0_i32 = arith.constant 0 : i32
    %c0_i32_0 = arith.constant 0 : i32
    %c0_i32_1 = arith.constant 0 : i32
    return %c0_i32, %c0_i32_0 : i32, i32
  }
  func.func @transform_3(%arg0: i32) -> (i32, i32) {
    %c0_i32 = arith.constant 0 : i32
    %c0_i32_0 = arith.constant 0 : i32
    %c0_i32_1 = arith.constant 0 : i32
    return %c0_i32, %c0_i32_0 : i32, i32
  }
  func.func @transform_4(%arg0: i32) -> (i32, i32) {
    %c0_i32 = arith.constant 0 : i32
    %c0_i32_0 = arith.constant 0 : i32
    %c0_i32_1 = arith.constant 0 : i32
    return %c0_i32, %c0_i32_0 : i32, i32
  }
  func.func @transform_5(%arg0: i32) -> (i32, i32) {
    %c0_i32 = arith.constant 0 : i32
    %c0_i32_0 = arith.constant 0 : i32
    %c0_i32_1 = arith.constant 0 : i32
    return %c0_i32, %c0_i32_0 : i32, i32
  }
  func.func @transform_6(%arg0: i32) -> (i32, i32) {
    %c0_i32 = arith.constant 0 : i32
    %c0_i32_0 = arith.constant 0 : i32
    return %arg0, %c0_i32 : i32, i32
  }
}

</mosaic_0001>

<bundles_post_ra>
// kernel: tpu_custom_call.1
= control target key start
LH: loop header
LB: loop body
LE: loop exit
PB: predicated region body
PF: predicated region fallthrough
CT: control target
= control target key end

     0   :  { %11 = vsyncpa [#allocation5], 0  ;;  %s2123_s0 = inlined_call_operand.hbm [shape: f32[8,8,32], index: 0, kind: input, shape index: {}]   ;;  %s2124_s1 = inlined_call_operand.hbm [shape: f32[8,32], index: 1, kind: input, shape index: {}]   ;;  %s2125_s2 = inlined_call_operand.hbm [shape: f32[64,128], index: 2, kind: input, shape index: {}]   ;;  %s2126_s3 = inlined_call_operand.hbm [shape: f32[32,128], index: 3, kind: input, shape index: {}]   ;;  %s2127_s4 = inlined_call_operand.vmem [shape: f32[1,128], index: 4, kind: input, shape index: {}]   ;;  %s2128_s5 = inlined_call_operand.vmem [shape: f32[1,32], index: 5, kind: input, shape index: {}]   ;;  %s2129_s6 = inlined_call_operand.hbm [shape: f32[8,32], index: 6, kind: output, shape index: {}]  }
   0x1   :  { %12 = vsyncpa [#allocation8], 0 }
   0x2   :  { %13 = vsyncpa [#allocation11], 0 }
   0x3   :  { %14 = vsyncpa [#allocation6], 0  ;;  %s1787_s21 = smov [#allocation7]   ;;  %s1788_s23 = smov [#allocation4]  }
   0x4   :  { %s33_s22 = sshll.u32 %s1787_s21, 4  ;;  %s20_s24 = sshll.u32 %s1788_s23, 4  ;;  %s34_s22 = int_to_ptr.vmem [resolvable:$true] %s33_s22  ;;  %s1834_s24 = int_to_ptr.vmem [resolvable:$true] %s20_s24 }
   0x5   :  { %s1669_s27 = scalar_lea.hbm %s2124_s1, 128 }
   0x6   :  { %p1670_p0 = scmp.ne.s32.totalorder %s2124_s1, %s1669_s27  ;;  %p1673_p1 = scmp.lt.u32.totalorder %s1669_s27, %s2124_s1 }
   0x8   :  { %p1675_p2 = pnand %p1673_p1, %p1670_p0 }
   0xa   :  { %1678 = shalt.err (!%p1675_p2)
}
   0xb   :  { %s1679_s8 = scalar_lea.vmem %s34_s22, 128  ;;  %p1684_p4 = scmp.lt.s32.totalorder %s34_s22, %s34_s22 }
   0xc   :  { %p1680_p3 = scmp.ne.s32.totalorder %s34_s22, %s1679_s8  ;;  %p1685_p5 = scmp.lt.s32.totalorder %s1679_s8, %s1679_s8 }
   0xe   :  { %p1686_p6 = por %p1685_p5, %p1684_p4 }
  0x10   :  { %p1687_p7 = pnand %p1686_p6, %p1680_p3 }
  0x12   :  { %1690 = shalt.err (!%p1687_p7)
}
  0x13   :  { %36 = dma.hbm_to_vmem [thread:$0]  %s2124_s1, 128, %s34_s22, [#allocation8]  }
  0x14   :  { %s1691_s13 = scalar_lea.hbm %s2123_s0, 1024 }
  0x15   :  { %p1692_p8 = scmp.ne.s32.totalorder %s2123_s0, %s1691_s13  ;;  %p1695_p9 = scmp.lt.u32.totalorder %s1691_s13, %s2123_s0 }
  0x17   :  { %p1697_p10 = pnand %p1695_p9, %p1692_p8 }
  0x19   :  { %1700 = shalt.err (!%p1697_p10)
}
  0x1a   :  { %s1701_s18 = scalar_lea.vmem %s1834_s24, 1024  ;;  %p1706_p12 = scmp.lt.s32.totalorder %s1834_s24, %s1834_s24 }
  0x1b   :  { %p1702_p11 = scmp.ne.s32.totalorder %s1834_s24, %s1701_s18  ;;  %p1707_p13 = scmp.lt.s32.totalorder %s1701_s18, %s1701_s18 }
  0x1d   :  { %p1708_p0 = por %p1707_p13, %p1706_p12 }
  0x1f   :  { %p1709_p1 = pnand %p1708_p0, %p1702_p11 }
  0x21   :  { %1712 = shalt.err (!%p1709_p1)
}
  0x22   :  { %s1789_s1 = smov 128   ;;  %s1790_s19 = smov 8  }
  0x23   :  { %26 = dma.hbm_to_vmem [thread:$0]  %s2123_s0, 1024, %s1834_s24, [#allocation5], %s1789_s1, %s1789_s1, %s1790_s19  }
  0x24   :  { %s1791_s22 = smov [#allocation9]   ;;  %s1792_s25 = smov [#allocation10]  }
  0x25   :  { %s42_s23 = sshll.u32 %s1791_s22, 4  ;;  %s54_s26 = sshll.u32 %s1792_s25, 4  ;;  %s43_s23 = int_to_ptr.vmem [resolvable:$true] %s42_s23  ;;  %s1868_s26 = int_to_ptr.vmem [resolvable:$true] %s54_s26 }
  0x26   :  { %s1713_s29 = scalar_lea.hbm %s2125_s2, 1024 }
  0x27   :  { %p1714_p2 = scmp.ne.s32.totalorder %s2125_s2, %s1713_s29  ;;  %p1717_p3 = scmp.lt.u32.totalorder %s1713_s29, %s2125_s2 }
  0x29   :  { %p1719_p4 = pnand %p1717_p3, %p1714_p2 }
  0x2b   :  { %1722 = shalt.err (!%p1719_p4)
}
  0x2c   :  { %s1723_s0 = scalar_lea.vmem %s43_s23, 1024  ;;  %p1728_p6 = scmp.lt.s32.totalorder %s43_s23, %s43_s23 }
  0x2d   :  { %p1724_p5 = scmp.ne.s32.totalorder %s43_s23, %s1723_s0  ;;  %p1729_p7 = scmp.lt.s32.totalorder %s1723_s0, %s1723_s0 }
  0x2f   :  { %p1730_p8 = por %p1729_p7, %p1728_p6 }
  0x31   :  { %p1731_p9 = pnand %p1730_p8, %p1724_p5 }
  0x33   :  { %1734 = shalt.err (!%p1731_p9)
}
  0x34   :  { %48 = dma.hbm_to_vmem [thread:$0]  %s2125_s2, 1024, %s43_s23, [#allocation8], %s1789_s1, %s1789_s1, %s1790_s19  }
  0x35   :  { %s1735_s13 = scalar_lea.hbm %s2126_s3, 512 }
  0x36   :  { %p1736_p10 = scmp.ne.s32.totalorder %s2126_s3, %s1735_s13  ;;  %p1739_p11 = scmp.lt.u32.totalorder %s1735_s13, %s2126_s3 }
  0x38   :  { %p1741_p12 = pnand %p1739_p11, %p1736_p10 }
  0x3a   :  { %1744 = shalt.err (!%p1741_p12)
}
  0x3b   :  { %s1745_s18 = scalar_lea.vmem %s1868_s26, 512  ;;  %p1750_p0 = scmp.lt.s32.totalorder %s1868_s26, %s1868_s26 }
  0x3c   :  { %p1746_p13 = scmp.ne.s32.totalorder %s1868_s26, %s1745_s18  ;;  %p1751_p1 = scmp.lt.s32.totalorder %s1745_s18, %s1745_s18 }
  0x3e   :  { %p1752_p2 = por %p1751_p1, %p1750_p0 }
  0x40   :  { %p1753_p3 = pnand %p1752_p2, %p1746_p13 }
  0x42   :  { %1756 = shalt.err (!%p1753_p3)
}
  0x43   :  { %60 = dma.hbm_to_vmem [thread:$0]  %s2126_s3, 512, %s1868_s26, [#allocation11], %s1789_s1, %s1789_s1, %s1790_s19  }
  0x44   :  { %1779 = dma.done.wait [#allocation5], 1024  }
  0x45   :  { %1780 = vsyncadd [#allocation5], 4294966272 }
  0x46   :  { %1781 = dma.done.wait [#allocation8], 1152  }
  0x47   :  { %1782 = vsyncadd [#allocation8], 4294966144 }
  0x48   :  { %1783 = dma.done.wait [#allocation11], 512  }
  0x49   :  { %1784 = vsyncadd [#allocation11], 4294966784  ;;  %v1793_v0 = vmov 0.0|0.0   ;;  %vm1794_vm0 = vmmov 0   ;;  %v1795_v1 = vmov 0.0   ;;  %v78_v2 = vld [vmem:[#allocation9] sm:$0xff]  ;;  %v324_v55 = vlaneseq }
  0x4a   :  { %1529 = vmatprep.subr.bf16.mxu0 %v1793_v0  ;;  %1418 = vmatprep.mubr.msk.f32.mxu0 %vm1794_vm0, %v1795_v1  ;;  %v79_v3 = vld [vmem:[#allocation9 + $0x8] sm:$0xff]  ;;  %v82_v4 = vld [vmem:[#allocation9 + $0x20] sm:$0xff]  ;;  %v80_v7 = vld [vmem:[#allocation9 + $0x10] sm:$0xff]  ;;  %vm97_vm1 = vcmask 261120   ;;  %s1797_s19 = smov 32  }
  0x4b   :  { %v1530_v5 = vpack.c.bf16 %v79_v3, %v78_v2  ;;  %v83_v6 = vld [vmem:[#allocation9 + $0x28] sm:$0xff]  ;;  %v81_v8 = vld [vmem:[#allocation9 + $0x18] sm:$0xff]  ;;  %v84_v10 = vld [vmem:[#allocation9 + $0x30] sm:$0xff]  ;;  %v325_v56 = vand.u32 127, %v324_v55 }
  0x4c   :  { %v1535_v9 = vpack.c.bf16 %v83_v6, %v82_v4  ;;  %v85_v11 = vld [vmem:[#allocation9 + $0x38] sm:$0xff]  ;;  %v1533_v12 = vpack.c.bf16 %v81_v8, %v80_v7  ;;  %v86_v15 = vld [vmem:[#allocation10] sm:$0xff]  ;;  %v87_v16 = vld [vmem:[#allocation10 + $0x8] sm:$0xff] }
  0x4d   :  { %1531 = vmatpush3.bf16.msra.mxu0 %v1530_v5  ;;  %v1539_v13 = vpack.c.bf16 %v85_v11, %v84_v10  ;;  %v171_v14 = vld [vmem:[#allocation4] sm:$0xff]  ;;  %v1910_v18 = vpack.c.bf16 %v87_v16, %v86_v15  ;;  %v88_v19 = vld [vmem:[#allocation10 + $0x10] sm:$0xff]  ;;  %v172_v21 = vld [vmem:[#allocation4 + $0x8] sm:$0xff]  ;;  %vm326_vm2 = vcmp.ge.s32.totalorder %v325_v56, 64  ;;  %vm327_vm3 = vcmp.lt.s32.totalorder %v325_v56, 96 }
  0x4e   :  { %1536 = vmatprep.subr.bf16.mxu1 %v1535_v9  ;;  %1532 = vmatprep.subr.bf16.mxu0 %v1793_v0  ;;  %v77_v17 = vld [vmem:[#allocation7] sm:$0xff]  ;;  %v173_v22 = vld [vmem:[#allocation4 + $0x10] sm:$0xff]  ;;  %v174_v24 = vld [vmem:[#allocation4 + $0x18] sm:$0xff] }
  0x4f   :  { %1538 = vmatpush3.bf16.msra.mxu1 %v1535_v9  ;;  %1429 = vmatprep.mubr.msk.f32.mxu1 %vm97_vm1, %v171_v14  ;;  %v89_v20 = vld [vmem:[#allocation10 + $0x18] sm:$0xff]  ;;  %v176_v26 = vld [vmem:[#allocation4 + $0x28] sm:$0xff]  ;;  %v177_v27 = vld [vmem:[#allocation4 + $0x30] sm:$0xff] }
  0x50   :  { %1540 = vmatprep.subr.bf16.mxu1 %v1539_v13  ;;  %v1916_v23 = vpack.c.bf16 %v89_v20, %v88_v19  ;;  %v175_v25 = vld [vmem:[#allocation4 + $0x20] sm:$0xff]  ;;  %v178_v28 = vld [vmem:[#allocation4 + $0x38] sm:$0xff]  ;;  %vm1958_vm4 = vmand %vm326_vm2, %vm327_vm3 }
  0x51   :  { %1534 = vmatpush3.bf16.msra.mxu0 %v1533_v12  ;;  %v1319_v29 = vld [vmem:[%s2127_s4] ss:$0 sm:$0xff]  ;;  %s1796_s4 = smov 64  }
  0x52   :  { %1543 = vmatprep.subr.bf16.mxu0 %v1793_v0  ;;  %v1352_v59 = vld [vmem:[%s2128_s5] ss:$0 sm:$0xff]  ;;  %s1798_s5 = smov [#allocation12]  }
  0x53   :  { %1542 = vmatpush3.bf16.msra.mxu1 %v1539_v13  ;;  %s1308_s23 = sshll.u32 %s1798_s5, 4  ;;  %s1309_s23 = int_to_ptr.vmem [resolvable:$true] %s1308_s23 }
  0x54   :  { %1419 = vmatmul.mubr.msk.f32.vlgmr.msra.gmra.mrb[0].mxu0 %vm97_vm1, %v77_v17  ;;  %1555 = vmatprep.subr.bf16.mxu1 %v1793_v0  ;;  %s1757_s25 = scalar_lea.vmem %s1309_s23, 128  ;;  %p1762_p5 = scmp.lt.s32.totalorder %s1309_s23, %s1309_s23 }
  0x55   :  { %1545 = vmatpush3.bf16.msra.mxu0 %v1910_v18  ;;  %1449 = vmatprep.mubr.msk.f32.mxu0 %vm1794_vm0, %v1795_v1  ;;  %p1758_p4 = scmp.ne.s32.totalorder %s1309_s23, %s1757_s25  ;;  %p1763_p6 = scmp.lt.s32.totalorder %s1757_s25, %s1757_s25 }
  0x56   :  { %1430 = vmatmul.mubr.msk.f32.vlgmr.msra.gmra.mrb[0].mxu1 %vm97_vm1, %v172_v21  ;;  %1546 = vmatprep.subr.bf16.mxu0 %v1793_v0 }
  0x57   :  { %1432 = vmatprep.mubr.msk.f32.mxu1 %vm97_vm1, %v173_v22  ;;  %1557 = vmatpush3.bf16.msra.mxu1 %v1910_v18  ;;  %p1764_p7 = por %p1763_p6, %p1762_p5 }
  0x58   :  { %1558 = vmatprep.subr.bf16.mxu1 %v1793_v0 }
  0x59   :  { %1548 = vmatpush3.bf16.msra.mxu0 %v1916_v23  ;;  %p1765_p8 = pnand %p1764_p7, %p1758_p4 }
  0x5a   :  { %1433 = vmatmul.mubr.msk.f32.gmra.mrb[2].mxu1 %vm97_vm1, %v174_v24  ;;  %1549 = vmatprep.subr.bf16.mxu0 %v1793_v0 }
  0x5b   :  { %1435 = vmatprep.mubr.msk.f32.mxu1 %vm97_vm1, %v175_v25  ;;  %1560 = vmatpush3.bf16.msra.mxu1 %v1916_v23 }
  0x5c   :  { %1450 = vmatmul.mubr.f32.vlgmr.msra.gmra.mrb[2].mxu0 %v1795_v1  ;;  %1567 = vmatprep.subr.bf16.mxu1 %v1793_v0 }
  0x5d   :  { %1551 = vmatpush3.bf16.msra.mxu0 %v1910_v18  ;;  %1460 = vmatprep.mubr.msk.f32.mxu0 %vm1794_vm0, %v1795_v1 }
  0x5e   :  { %1436 = vmatmul.mubr.msk.f32.gmra.mrb[4].mxu1 %vm97_vm1, %v176_v26  ;;  %1552 = vmatprep.subr.bf16.mxu0 %v1793_v0 }
  0x5f   :  { %1438 = vmatprep.mubr.msk.f32.mxu1 %vm97_vm1, %v177_v27 }
  0x61   :  { %1554 = vmatpush3.bf16.msra.mxu0 %v1916_v23 }
  0x62   :  { %1439 = vmatmul.mubr.msk.f32.gmra.mrb[6].mxu1 %vm97_vm1, %v178_v28  ;;  %1561 = vmatprep.subr.bf16.mxu0 %v1793_v0 }
  0x63   :  { %1471 = vmatprep.mubr.msk.f32.mxu1 %vm1794_vm0, %v1795_v1 }
 0x127   :  { %v167_v30 = vpop.f32.mrb[0].mxu0 }
 0x128   :  { %v168_v31 = vadd.f32 %v1319_v29, %v167_v30  ;;  %v1420_v32 = vpop.f32.mrb[1].mxu0 }
 0x129   :  { %v1431_v33 = vpop.f32.mrb[0].mxu1 }
 0x12a   :  { %v309_v34 = vadd.f32 %v1431_v33, %v168_v31  ;;  %v269_v35 = vpop.f32.mrb[1].mxu1 }
 0x12b   :  { %v308_v36 = vadd.f32 %v269_v35, %v168_v31 }
 0x12d   :  { %v1434_v37 = vpop.f32.mrb[2].mxu1 }
 0x12e   :  { %v1946_v38 = vadd.f32 %v1434_v37, %v168_v31  ;;  %v279_v39 = vpop.f32.mrb[3].mxu1 }
 0x12f   :  { %v1948_v40 = vadd.f32 %v279_v39, %v168_v31  ;;  %v399_v41 = vpop.f32.mrb[2].mxu0 }
 0x130   :  { %v403_v42 = vadd.f32 %v399_v41, %v308_v36  ;;  %v1451_v43 = vpop.f32.mrb[3].mxu0 }
 0x131   :  { %v1437_v44 = vpop.f32.mrb[4].mxu1 }
 0x132   :  { %v1329_v45 = vmul.f32 -1.442695, %v403_v42  ;;  %v1950_v46 = vadd.f32 %v1437_v44, %v168_v31  ;;  %v289_v47 = vpop.f32.mrb[5].mxu1 }
 0x133   :  { %v1952_v48 = vadd.f32 %v289_v47, %v168_v31 }
 0x134   :  { %1603 = vpow2.f32 %v1329_v45 }
 0x135   :  { %v1440_v49 = vpop.f32.mrb[6].mxu1 }
 0x136   :  { %v1954_v50 = vadd.f32 %v1440_v49, %v168_v31  ;;  %v299_v51 = vpop.f32.mrb[7].mxu1 }
 0x137   :  { %v1956_v52 = vadd.f32 %v299_v51, %v168_v31 }
 0x13e   :  { %v1604_v53 = vpop.eup %1603 }
 0x13f   :  { %v407_v54 = vadd.f32 1.0, %v1604_v53 }
 0x141   :  { %1605 = vrcp.f32 %v407_v54 }
 0x14b   :  { %v1606_v57 = vpop.eup %1605 }
 0x14c   :  { %v410_v58 = vmul.f32 2.0, %v1606_v57 }
 0x14e   :  { %v1330_v60 = vadd.f32 -1.0, %v410_v58 }
 0x150   :  { %v412_v61 = vsel %vm1958_vm4, %v1330_v60, %v1606_v57 }
 0x151   :  { %415 = vrot.lane.b32.xlu0 %v412_v61, %s1796_s4  ;;  %v413_v2 = vmul.f32 0.0, %v412_v61 }
 0x1c3   :  { %v416_v62 = vpop.permute.xlu0 %415 }
 0x1c4   :  { %v418_v63 = vmul.f32 %v416_v62, %v412_v61 }
 0x1c6   :  { %420 = vrot.lane.b32.xlu0 %v418_v63, %s1797_s19 }
 0x238   :  { %v421_v3 = vpop.permute.xlu0 %420 }
 0x239   :  { %v423_v4 = vadd.f32 %v421_v3, %v413_v2 }
 0x23b   :  { %1607 = vtanh.f32 %v423_v4 }
 0x245   :  { %v1608_v5 = vpop.eup %1607 }
 0x246   :  { %426 = vrot.lane.b32.xlu1 %v1608_v5, %s1796_s4 }
 0x2b8   :  { %v427_v6 = vpop.permute.xlu1 %426 }
 0x2b9   :  { %v429_v7 = vmul.f32 %v427_v6, %v412_v61 }
 0x2bb   :  { %431 = vrot.lane.b32.xlu1 %v429_v7, %s1797_s19 }
 0x32d   :  { %v432_v8 = vpop.permute.xlu1 %431 }
 0x32e   :  { %434 = vst.msk [vmem:[#allocation3] sm:$0xff] %vm97_vm1, %v432_v8  ;;  %1461 = vmatmul.mubr.msk.f32.vlgmr.msra.gmra.mrb[4].mxu0 %vm97_vm1, %v432_v8 }
 0x32f   :  { %1563 = vmatpush3.bf16.msra.mxu0 %v1910_v18  ;;  %1482 = vmatprep.mubr.msk.f32.mxu0 %vm1794_vm0, %v1795_v1 }
 0x330   :  { %1564 = vmatprep.subr.bf16.mxu0 %v1793_v0 }
 0x333   :  { %1566 = vmatpush3.bf16.msra.mxu0 %v1916_v23 }
 0x334   :  { %1573 = vmatprep.subr.bf16.mxu0 %v1793_v0 }
 0x401   :  { %v505_v9 = vpop.f32.mrb[4].mxu0 }
 0x402   :  { %v509_v10 = vadd.f32 %v505_v9, %v309_v34  ;;  %v1462_v11 = vpop.f32.mrb[5].mxu0 }
 0x404   :  { %v1332_v12 = vmul.f32 -1.442695, %v509_v10 }
 0x406   :  { %1609 = vpow2.f32 %v1332_v12 }
 0x410   :  { %v1610_v13 = vpop.eup %1609 }
 0x411   :  { %v513_v14 = vadd.f32 1.0, %v1610_v13 }
 0x413   :  { %1611 = vrcp.f32 %v513_v14 }
 0x41d   :  { %v1612_v15 = vpop.eup %1611 }
 0x41e   :  { %v516_v16 = vmul.f32 2.0, %v1612_v15 }
 0x420   :  { %v1333_v17 = vadd.f32 -1.0, %v516_v16 }
 0x422   :  { %v518_v19 = vsel %vm1958_vm4, %v1333_v17, %v1612_v15 }
 0x423   :  { %521 = vrot.lane.b32.xlu0 %v518_v19, %s1796_s4  ;;  %v519_v22 = vmul.f32 %v518_v19, %v423_v4 }
 0x495   :  { %v522_v20 = vpop.permute.xlu0 %521 }
 0x496   :  { %v524_v21 = vmul.f32 %v522_v20, %v518_v19 }
 0x498   :  { %526 = vrot.lane.b32.xlu1 %v524_v21, %s1797_s19 }
 0x50a   :  { %v527_v24 = vpop.permute.xlu1 %526 }
 0x50b   :  { %v529_v25 = vadd.f32 %v527_v24, %v519_v22 }
 0x50d   :  { %1613 = vtanh.f32 %v529_v25 }
 0x517   :  { %v1614_v26 = vpop.eup %1613 }
 0x518   :  { %532 = vrot.lane.b32.xlu0 %v1614_v26, %s1796_s4 }
 0x58a   :  { %v533_v27 = vpop.permute.xlu0 %532 }
 0x58b   :  { %v535_v28 = vmul.f32 %v533_v27, %v518_v19 }
 0x58d   :  { %537 = vrot.lane.b32.xlu1 %v535_v28, %s1797_s19 }
 0x5ff   :  { %v538_v29 = vpop.permute.xlu1 %537 }
 0x600   :  { %541 = vst.msk [vmem:[#allocation3 + $0x8] sm:$0xff] %vm97_vm1, %v538_v29  ;;  %1472 = vmatmul.mubr.msk.f32.vlgmr.msra.gmra.mrb[8].mxu1 %vm97_vm1, %v538_v29 }
 0x601   :  { %1569 = vmatpush3.bf16.msra.mxu1 %v1910_v18  ;;  %1493 = vmatprep.mubr.msk.f32.mxu1 %vm1794_vm0, %v1795_v1 }
 0x602   :  { %1570 = vmatprep.subr.bf16.mxu1 %v1793_v0 }
 0x605   :  { %1572 = vmatpush3.bf16.msra.mxu1 %v1916_v23 }
 0x606   :  { %1579 = vmatprep.subr.bf16.mxu1 %v1793_v0 }
 0x6d3   :  { %v612_v30 = vpop.f32.mrb[8].mxu1 }
 0x6d4   :  { %v616_v31 = vadd.f32 %v612_v30, %v1948_v40  ;;  %v1473_v32 = vpop.f32.mrb[9].mxu1 }
 0x6d6   :  { %v1335_v33 = vmul.f32 -1.442695, %v616_v31 }
 0x6d8   :  { %1615 = vpow2.f32 %v1335_v33 }
 0x6e2   :  { %v1616_v34 = vpop.eup %1615 }
 0x6e3   :  { %v620_v35 = vadd.f32 1.0, %v1616_v34 }
 0x6e5   :  { %1617 = vrcp.f32 %v620_v35 }
 0x6ef   :  { %v1618_v36 = vpop.eup %1617 }
 0x6f0   :  { %v623_v37 = vmul.f32 2.0, %v1618_v36 }
 0x6f2   :  { %v1336_v39 = vadd.f32 -1.0, %v623_v37 }
 0x6f4   :  { %v625_v41 = vsel %vm1958_vm4, %v1336_v39, %v1618_v36 }
 0x6f5   :  { %628 = vrot.lane.b32.xlu0 %v625_v41, %s1796_s4  ;;  %v626_v44 = vmul.f32 %v625_v41, %v529_v25 }
 0x767   :  { %v629_v42 = vpop.permute.xlu0 %628 }
 0x768   :  { %v631_v43 = vmul.f32 %v629_v42, %v625_v41 }
 0x76a   :  { %633 = vrot.lane.b32.xlu1 %v631_v43, %s1797_s19 }
 0x7dc   :  { %v634_v40 = vpop.permute.xlu1 %633 }
 0x7dd   :  { %v636_v45 = vadd.f32 %v634_v40, %v626_v44 }
 0x7df   :  { %1619 = vtanh.f32 %v636_v45 }
 0x7e9   :  { %v1620_v47 = vpop.eup %1619 }
 0x7ea   :  { %639 = vrot.lane.b32.xlu0 %v1620_v47, %s1796_s4 }
 0x85c   :  { %v640_v49 = vpop.permute.xlu0 %639 }
 0x85d   :  { %v642_v51 = vmul.f32 %v640_v49, %v625_v41 }
 0x85f   :  { %644 = vrot.lane.b32.xlu1 %v642_v51, %s1797_s19 }
 0x8d1   :  { %v645_v53 = vpop.permute.xlu1 %644 }
 0x8d2   :  { %648 = vst.msk [vmem:[#allocation3 + $0x10] sm:$0xff] %vm97_vm1, %v645_v53  ;;  %1483 = vmatmul.mubr.msk.f32.vlgmr.msra.gmra.mrb[6].mxu0 %vm97_vm1, %v645_v53 }
 0x8d3   :  { %1575 = vmatpush3.bf16.msra.mxu0 %v1910_v18  ;;  %1504 = vmatprep.mubr.msk.f32.mxu0 %vm1794_vm0, %v1795_v1 }
 0x8d4   :  { %1576 = vmatprep.subr.bf16.mxu0 %v1793_v0 }
 0x8d7   :  { %1578 = vmatpush3.bf16.msra.mxu0 %v1916_v23 }
 0x8d8   :  { %1585 = vmatprep.subr.bf16.mxu0 %v1793_v0 }
 0x9a5   :  { %v719_v54 = vpop.f32.mrb[6].mxu0 }
 0x9a6   :  { %v723_v55 = vadd.f32 %v719_v54, %v1946_v38  ;;  %v1484_v56 = vpop.f32.mrb[7].mxu0 }
 0x9a8   :  { %v1338_v57 = vmul.f32 -1.442695, %v723_v55 }
 0x9aa   :  { %1621 = vpow2.f32 %v1338_v57 }
 0x9b4   :  { %v1622_v58 = vpop.eup %1621 }
 0x9b5   :  { %v727_v60 = vadd.f32 1.0, %v1622_v58 }
 0x9b7   :  { %1623 = vrcp.f32 %v727_v60 }
 0x9c1   :  { %v1624_v61 = vpop.eup %1623 }
 0x9c2   :  { %v730_v62 = vmul.f32 2.0, %v1624_v61 }
 0x9c4   :  { %v1339_v63 = vadd.f32 -1.0, %v730_v62 }
 0x9c6   :  { %v732_v2 = vsel %vm1958_vm4, %v1339_v63, %v1624_v61 }
 0x9c7   :  { %735 = vrot.lane.b32.xlu0 %v732_v2, %s1796_s4  ;;  %v733_v5 = vmul.f32 %v732_v2, %v636_v45 }
 0xa39   :  { %v736_v3 = vpop.permute.xlu0 %735 }
 0xa3a   :  { %v738_v4 = vmul.f32 %v736_v3, %v732_v2 }
 0xa3c   :  { %740 = vrot.lane.b32.xlu1 %v738_v4, %s1797_s19 }
 0xaae   :  { %v741_v38 = vpop.permute.xlu1 %740 }
 0xaaf   :  { %v743_v6 = vadd.f32 %v741_v38, %v733_v5 }
 0xab1   :  { %1625 = vtanh.f32 %v743_v6 }
 0xabb   :  { %v1626_v7 = vpop.eup %1625 }
 0xabc   :  { %746 = vrot.lane.b32.xlu0 %v1626_v7, %s1796_s4 }
 0xb2e   :  { %v747_v8 = vpop.permute.xlu0 %746 }
 0xb2f   :  { %v749_v9 = vmul.f32 %v747_v8, %v732_v2 }
 0xb31   :  { %751 = vrot.lane.b32.xlu1 %v749_v9, %s1797_s19 }
 0xba3   :  { %v752_v10 = vpop.permute.xlu1 %751 }
 0xba4   :  { %755 = vst.msk [vmem:[#allocation3 + $0x18] sm:$0xff] %vm97_vm1, %v752_v10  ;;  %1494 = vmatmul.mubr.msk.f32.vlgmr.msra.gmra.mrb[10].mxu1 %vm97_vm1, %v752_v10 }
 0xba5   :  { %1581 = vmatpush3.bf16.msra.mxu1 %v1910_v18  ;;  %1515 = vmatprep.mubr.msk.f32.mxu1 %vm1794_vm0, %v1795_v1 }
 0xba6   :  { %1582 = vmatprep.subr.bf16.mxu1 %v1793_v0 }
 0xba9   :  { %1584 = vmatpush3.bf16.msra.mxu1 %v1916_v23 }
 0xc77   :  { %v826_v11 = vpop.f32.mrb[10].mxu1 }
 0xc78   :  { %v830_v12 = vadd.f32 %v826_v11, %v1952_v48  ;;  %v1495_v13 = vpop.f32.mrb[11].mxu1 }
 0xc7a   :  { %v1341_v14 = vmul.f32 -1.442695, %v830_v12 }
 0xc7c   :  { %1627 = vpow2.f32 %v1341_v14 }
 0xc86   :  { %v1628_v15 = vpop.eup %1627 }
 0xc87   :  { %v834_v16 = vadd.f32 1.0, %v1628_v15 }
 0xc89   :  { %1629 = vrcp.f32 %v834_v16 }
 0xc93   :  { %v1630_v17 = vpop.eup %1629 }
 0xc94   :  { %v837_v19 = vmul.f32 2.0, %v1630_v17 }
 0xc96   :  { %v1342_v20 = vadd.f32 -1.0, %v837_v19 }
 0xc98   :  { %v839_v21 = vsel %vm1958_vm4, %v1342_v20, %v1630_v17 }
 0xc99   :  { %842 = vrot.lane.b32.xlu0 %v839_v21, %s1796_s4  ;;  %v840_v25 = vmul.f32 %v839_v21, %v743_v6 }
 0xd0b   :  { %v843_v22 = vpop.permute.xlu0 %842 }
 0xd0c   :  { %v845_v24 = vmul.f32 %v843_v22, %v839_v21  ;;  %v2057_v22 = vld [vmem:[#allocation3] sm:$0xff] }
 0xd0e   :  { %847 = vrot.lane.b32.xlu1 %v845_v24, %s1797_s19  ;;  %v1199_v24 = vmul.f32 %v1352_v59, %v2057_v22 }
 0xd80   :  { %v848_v48 = vpop.permute.xlu1 %847 }
 0xd81   :  { %v850_v26 = vadd.f32 %v848_v48, %v840_v25  ;;  %v2063_v25 = vld [vmem:[#allocation3 + $0x10] sm:$0xff]  ;;  %v1207_v48 = vsel %vm97_vm1, %v1199_v24, 0.0 }
 0xd83   :  { %1631 = vtanh.f32 %v850_v26 }
 0xd8d   :  { %v1632_v27 = vpop.eup %1631 }
 0xd8e   :  { %853 = vrot.lane.b32.xlu0 %v1632_v27, %s1796_s4  ;;  %v2067_v27 = vld [vmem:[#allocation3 + $0x18] sm:$0xff] }
 0xe00   :  { %v854_v28 = vpop.permute.xlu0 %853 }
 0xe01   :  { %v856_v29 = vmul.f32 %v854_v28, %v839_v21 }
 0xe03   :  { %858 = vrot.lane.b32.xlu1 %v856_v29, %s1797_s19  ;;  %v1202_v29 = vmul.f32 %v1352_v59, %v2067_v27 }
 0xe75   :  { %v859_v30 = vpop.permute.xlu1 %858 }
 0xe76   :  { %862 = vst.msk [vmem:[#allocation3 + $0x20] sm:$0xff] %vm97_vm1, %v859_v30  ;;  %1505 = vmatmul.mubr.msk.f32.vlgmr.msra.gmra.mrb[8].mxu0 %vm97_vm1, %v859_v30 }
 0xe77   :  { %1587 = vmatpush3.bf16.msra.mxu0 %v1910_v18  ;;  %1526 = vmatprep.mubr.msk.f32.mxu0 %vm1794_vm0, %v1795_v1 }
 0xe78   :  { %1588 = vmatprep.subr.bf16.mxu0 %v1793_v0 }
 0xe7b   :  { %1590 = vmatpush3.bf16.msra.mxu0 %v1916_v23 }
 0xf49   :  { %v933_v31 = vpop.f32.mrb[8].mxu0 }
 0xf4a   :  { %v937_v32 = vadd.f32 %v933_v31, %v1950_v46  ;;  %v1506_v33 = vpop.f32.mrb[9].mxu0  ;;  %v1216_v31 = vsel %vm97_vm1, %v1202_v29, 0.0 }
 0xf4c   :  { %v1344_v34 = vmul.f32 -1.442695, %v937_v32 }
 0xf4e   :  { %1633 = vpow2.f32 %v1344_v34 }
 0xf58   :  { %v1634_v35 = vpop.eup %1633 }
 0xf59   :  { %v941_v36 = vadd.f32 1.0, %v1634_v35 }
 0xf5b   :  { %1635 = vrcp.f32 %v941_v36  ;;  %v2077_v36 = vld [vmem:[#allocation3 + $0x8] sm:$0xff] }
 0xf65   :  { %v1636_v37 = vpop.eup %1635 }
 0xf66   :  { %v944_v39 = vmul.f32 2.0, %v1636_v37 }
 0xf68   :  { %v1345_v41 = vadd.f32 -1.0, %v944_v39  ;;  %v2080_v39 = vld [vmem:[#allocation3 + $0x20] sm:$0xff] }
 0xf6a   :  { %v946_v18 = vsel %vm1958_vm4, %v1345_v41, %v1636_v37  ;;  %v1200_v37 = vmul.f32 %v1352_v59, %v2077_v36 }
 0xf6b   :  { %949 = vrot.lane.b32.xlu0 %v946_v18, %s1796_s4  ;;  %v947_v23 = vmul.f32 %v946_v18, %v850_v26  ;;  %v1201_v26 = vmul.f32 %v1352_v59, %v2063_v25 }
 0xf6c   :  { %v1210_v41 = vsel %vm97_vm1, %v1200_v37, 0.0 }
 0xf6d   :  { %v1213_v28 = vsel %vm97_vm1, %v1201_v26, 0.0 }
 0xfdd   :  { %v950_v0 = vpop.permute.xlu0 %949 }
 0xfde   :  { %v952_v1 = vmul.f32 %v950_v0, %v946_v18 }
 0xfe0   :  { %954 = vrot.lane.b32.xlu1 %v952_v1, %s1797_s19 }
0x1052   :  { %v955_v46 = vpop.permute.xlu1 %954 }
0x1053   :  { %v957_v42 = vadd.f32 %v955_v46, %v947_v23 }
0x1055   :  { %1637 = vtanh.f32 %v957_v42 }
0x105f   :  { %v1638_v43 = vpop.eup %1637 }
0x1060   :  { %960 = vrot.lane.b32.xlu0 %v1638_v43, %s1796_s4 }
0x10d2   :  { %v961_v44 = vpop.permute.xlu0 %960 }
0x10d3   :  { %v963_v40 = vmul.f32 %v961_v44, %v946_v18  ;;  %v1203_v18 = vmul.f32 %v1352_v59, %v2080_v39 }
0x10d5   :  { %965 = vrot.lane.b32.xlu1 %v963_v40, %s1797_s19  ;;  %v1219_v1 = vsel %vm97_vm1, %v1203_v18, 0.0 }
0x1147   :  { %v966_v45 = vpop.permute.xlu1 %965 }
0x1148   :  { %969 = vst.msk [vmem:[#allocation3 + $0x28] sm:$0xff] %vm97_vm1, %v966_v45  ;;  %1516 = vmatmul.mubr.msk.f32.vlgmr.msra.gmra.mrb[12].mxu1 %vm97_vm1, %v966_v45 }
0x114f   :  { %v2071_v30 = vld [vmem:[#allocation3 + $0x28] sm:$0xff] }
0x1150   :  { %v1204_v32 = vmul.f32 %v1352_v59, %v2071_v30 }
0x1152   :  { %v1222_v33 = vsel %vm97_vm1, %v1204_v32, 0.0 }
0x121b   :  { %v1040_v47 = vpop.f32.mrb[12].mxu1 }
0x121c   :  { %v1044_v49 = vadd.f32 %v1040_v47, %v1956_v52  ;;  %v1517_v51 = vpop.f32.mrb[13].mxu1 }
0x121e   :  { %v1347_v53 = vmul.f32 -1.442695, %v1044_v49 }
0x1220   :  { %1639 = vpow2.f32 %v1347_v53 }
0x122a   :  { %v1640_v54 = vpop.eup %1639 }
0x122b   :  { %v1048_v55 = vadd.f32 1.0, %v1640_v54 }
0x122d   :  { %1641 = vrcp.f32 %v1048_v55 }
0x1237   :  { %v1642_v56 = vpop.eup %1641 }
0x1238   :  { %v1051_v57 = vmul.f32 2.0, %v1642_v56 }
0x123a   :  { %v1348_v58 = vadd.f32 -1.0, %v1051_v57 }
0x123c   :  { %v1053_v60 = vsel %vm1958_vm4, %v1348_v58, %v1642_v56 }
0x123d   :  { %1056 = vrot.lane.b32.xlu0 %v1053_v60, %s1796_s4  ;;  %v1054_v63 = vmul.f32 %v1053_v60, %v957_v42 }
0x12af   :  { %v1057_v61 = vpop.permute.xlu0 %1056 }
0x12b0   :  { %v1059_v62 = vmul.f32 %v1057_v61, %v1053_v60 }
0x12b2   :  { %1061 = vrot.lane.b32.xlu1 %v1059_v62, %s1797_s19 }
0x1324   :  { %v1062_v52 = vpop.permute.xlu1 %1061 }
0x1325   :  { %v1064_v2 = vadd.f32 %v1062_v52, %v1054_v63 }
0x1327   :  { %1643 = vtanh.f32 %v1064_v2 }
0x1331   :  { %v1644_v3 = vpop.eup %1643 }
0x1332   :  { %1067 = vrot.lane.b32.xlu0 %v1644_v3, %s1796_s4 }
0x13a4   :  { %v1068_v4 = vpop.permute.xlu0 %1067 }
0x13a5   :  { %v1070_v5 = vmul.f32 %v1068_v4, %v1053_v60 }
0x13a7   :  { %1072 = vrot.lane.b32.xlu1 %v1070_v5, %s1797_s19 }
0x1419   :  { %v1073_v38 = vpop.permute.xlu1 %1072 }
0x141a   :  { %1076 = vst.msk [vmem:[#allocation3 + $0x30] sm:$0xff] %vm97_vm1, %v1073_v38  ;;  %1527 = vmatmul.mubr.msk.f32.vlgmr.msra.gmra.mrb[10].mxu0 %vm97_vm1, %v1073_v38 }
0x1421   :  { %v2084_v0 = vld [vmem:[#allocation3 + $0x30] sm:$0xff] }
0x1422   :  { %v1205_v23 = vmul.f32 %v1352_v59, %v2084_v0 }
0x1424   :  { %v1225_v46 = vsel %vm97_vm1, %v1205_v23, 0.0 }
0x14ed   :  { %v1147_v6 = vpop.f32.mrb[10].mxu0 }
0x14ee   :  { %v1151_v7 = vadd.f32 %v1147_v6, %v1954_v50  ;;  %v1528_v8 = vpop.f32.mrb[11].mxu0 }
0x14f0   :  { %v1350_v9 = vmul.f32 -1.442695, %v1151_v7 }
0x14f2   :  { %1645 = vpow2.f32 %v1350_v9 }
0x14fc   :  { %v1646_v10 = vpop.eup %1645 }
0x14fd   :  { %v1155_v11 = vadd.f32 1.0, %v1646_v10 }
0x14ff   :  { %1647 = vrcp.f32 %v1155_v11 }
0x1509   :  { %v1648_v12 = vpop.eup %1647 }
0x150a   :  { %v1158_v13 = vmul.f32 2.0, %v1648_v12 }
0x150c   :  { %v1351_v14 = vadd.f32 -1.0, %v1158_v13 }
0x150e   :  { %v1160_v15 = vsel %vm1958_vm4, %v1351_v14, %v1648_v12 }
0x150f   :  { %1163 = vrot.lane.b32.xlu0 %v1160_v15, %s1796_s4  ;;  %v1161_v19 = vmul.f32 %v1160_v15, %v1064_v2 }
0x1581   :  { %v1164_v16 = vpop.permute.xlu0 %1163 }
0x1582   :  { %v1166_v17 = vmul.f32 %v1164_v16, %v1160_v15 }
0x1584   :  { %1168 = vrot.lane.b32.xlu1 %v1166_v17, %s1797_s19 }
0x15f6   :  { %v1169_v50 = vpop.permute.xlu1 %1168 }
0x15f7   :  { %v1171_v20 = vadd.f32 %v1169_v50, %v1161_v19 }
0x15f9   :  { %1649 = vtanh.f32 %v1171_v20 }
0x1603   :  { %v1650_v21 = vpop.eup %1649 }
0x1604   :  { %1174 = vrot.lane.b32.xlu0 %v1650_v21, %s1796_s4 }
0x1623   :  { %1208 = vadd.xlane.f32.xlu0 %v1207_v48 }
0x1627   :  { %1214 = vadd.xlane.f32.xlu0 %v1213_v28 }
0x162b   :  { %1217 = vadd.xlane.f32.xlu0 %v1216_v31 }
0x162f   :  { %1223 = vadd.xlane.f32.xlu0 %v1222_v33 }
0x1676   :  { %v1175_v34 = vpop.permute.xlu0 %1174 }
0x1677   :  { %v1177_v35 = vmul.f32 %v1175_v34, %v1160_v15 }
0x1679   :  { %1179 = vrot.lane.b32.xlu1 %v1177_v35, %s1797_s19 }
0x169d   :  { %1211 = vadd.xlane.f32.xlu1 %v1210_v41 }
0x16a1   :  { %1220 = vadd.xlane.f32.xlu1 %v1219_v1 }
0x16a5   :  { %1226 = vadd.xlane.f32.xlu1 %v1225_v46 }
0x16b0   :  { %v1209_v45 = vpop.xlane.xlu0 %1208 }
0x16b4   :  { %v1215_v47 = vpop.xlane.xlu0 %1214 }
0x16b8   :  { %v1218_v51 = vpop.xlane.xlu0 %1217 }
0x16bc   :  { %v1224_v54 = vpop.xlane.xlu0 %1223 }
0x16eb   :  { %v1180_v42 = vpop.permute.xlu1 %1179 }
0x16ec   :  { %1183 = vst.msk [vmem:[#allocation3 + $0x38] sm:$0xff] %vm97_vm1, %v1180_v42 }
0x16f3   :  { %v2090_v43 = vld [vmem:[#allocation3 + $0x38] sm:$0xff] }
0x16f4   :  { %v1206_v44 = vmul.f32 %v1352_v59, %v2090_v43 }
0x16f6   :  { %v1228_v40 = vsel %vm97_vm1, %v1206_v44, 0.0 }
0x16f7   :  { %1229 = vadd.xlane.f32.xlu0 %v1228_v40 }
0x172a   :  { %v1212_v49 = vpop.xlane.xlu1 %1211 }
0x172b   :  { %v1232_v58 = vmax.f32 %v1212_v49, %v1224_v54 }
0x172e   :  { %v1221_v53 = vpop.xlane.xlu1 %1220 }
0x172f   :  { %v1231_v56 = vmax.f32 %v1209_v45, %v1221_v53 }
0x1731   :  { %v1235_v62 = vmax.f32 %v1231_v56, %v1232_v58 }
0x1732   :  { %v1227_v55 = vpop.xlane.xlu1 %1226 }
0x1733   :  { %v1233_v60 = vmax.f32 %v1215_v47, %v1227_v55 }
0x1784   :  { %v1230_v57 = vpop.xlane.xlu0 %1229 }
0x1785   :  { %v1234_v61 = vmax.f32 %v1218_v51, %v1230_v57 }
0x1787   :  { %v1236_v63 = vmax.f32 %v1233_v60, %v1234_v61 }
0x1789   :  { %v1237_v52 = vmax.f32 %v1235_v62, %v1236_v63 }
0x178b   :  { %v1238_v2 = vsub.f32 %v1209_v45, %v1237_v52  ;;  %v1239_v3 = vsub.f32 %v1212_v49, %v1237_v52  ;;  %v1240_v4 = vsub.f32 %v1215_v47, %v1237_v52  ;;  %v1241_v5 = vsub.f32 %v1218_v51, %v1237_v52 }
0x178c   :  { %v1242_v7 = vsub.f32 %v1221_v53, %v1237_v52  ;;  %v1243_v9 = vsub.f32 %v1224_v54, %v1237_v52  ;;  %v1244_v11 = vsub.f32 %v1227_v55, %v1237_v52  ;;  %v1245_v13 = vsub.f32 %v1230_v57, %v1237_v52 }
0x178d   :  { %v1246_v38 = vmul.f32 1.442695, %v1238_v2  ;;  %v1248_v6 = vmul.f32 1.442695, %v1239_v3  ;;  %v1250_v8 = vmul.f32 1.442695, %v1240_v4 }
0x178e   :  { %v1252_v10 = vmul.f32 1.442695, %v1241_v5  ;;  %v1254_v12 = vmul.f32 1.442695, %v1242_v7  ;;  %v1256_v14 = vmul.f32 1.442695, %v1243_v9 }
0x178f   :  { %1651 = vpow2.f32 %v1246_v38  ;;  %v1258_v15 = vmul.f32 1.442695, %v1244_v11  ;;  %v1260_v16 = vmul.f32 1.442695, %v1245_v13 }
0x1790   :  { %1653 = vpow2.f32 %v1248_v6 }
0x1791   :  { %1655 = vpow2.f32 %v1250_v8 }
0x1792   :  { %1657 = vpow2.f32 %v1252_v10 }
0x1793   :  { %1659 = vpow2.f32 %v1254_v12 }
0x1794   :  { %1661 = vpow2.f32 %v1256_v14 }
0x1795   :  { %1663 = vpow2.f32 %v1258_v15 }
0x1796   :  { %1665 = vpow2.f32 %v1260_v16 }
0x1799   :  { %v1652_v17 = vpop.eup %1651 }
0x179a   :  { %v1654_v19 = vpop.eup %1653 }
0x179b   :  { %v1262_v50 = vadd.f32 %v1654_v19, %v1652_v17  ;;  %v1656_v20 = vpop.eup %1655 }
0x179c   :  { %v1658_v59 = vpop.eup %1657 }
0x179d   :  { %v1263_v21 = vadd.f32 %v1656_v20, %v1262_v50  ;;  %v1660_v48 = vpop.eup %1659 }
0x179e   :  { %v1662_v28 = vpop.eup %1661 }
0x179f   :  { %v1264_v24 = vadd.f32 %v1658_v59, %v1263_v21  ;;  %v1664_v31 = vpop.eup %1663 }
0x17a0   :  { %v1666_v33 = vpop.eup %1665 }
0x17a1   :  { %v1265_v26 = vadd.f32 %v1660_v48, %v1264_v24 }
0x17a3   :  { %v1266_v29 = vadd.f32 %v1662_v28, %v1265_v26 }
0x17a5   :  { %v1267_v32 = vadd.f32 %v1664_v31, %v1266_v29 }
0x17a7   :  { %v1268_v34 = vadd.f32 %v1666_v33, %v1267_v32 }
0x17a9   :  { %1667 = vrcp.f32 %v1268_v34 }
0x17b3   :  { %v1668_v35 = vpop.eup %1667 }
0x17b4   :  { %v1270_v37 = vmul.f32 %v1668_v35, %v1652_v17  ;;  %v1271_v41 = vmul.f32 %v1668_v35, %v1654_v19  ;;  %v1272_v18 = vmul.f32 %v1668_v35, %v1656_v20  ;;  %v1273_v1 = vmul.f32 %v1668_v35, %v1658_v59 }
0x17b5   :  { %v1274_v23 = vmul.f32 %v1668_v35, %v1660_v48  ;;  %v1275_v40 = vmul.f32 %v1668_v35, %v1662_v28  ;;  %v1276_v53 = vmul.f32 %v1668_v35, %v1664_v31  ;;  %v1277_v57 = vmul.f32 %v1668_v35, %v1666_v33 }
0x17b6   :  { %v1278_v46 = vmul.f32 %v1270_v37, %v2057_v22  ;;  %v1279_v42 = vmul.f32 %v1271_v41, %v2077_v36  ;;  %v1280_v44 = vmul.f32 %v1272_v18, %v2063_v25  ;;  %v1281_v45 = vmul.f32 %v1273_v1, %v2067_v27 }
0x17b7   :  { %v1282_v54 = vmul.f32 %v1274_v23, %v2080_v39  ;;  %v1283_v22 = vmul.f32 %v1275_v40, %v2071_v30  ;;  %v1284_v58 = vmul.f32 %v1276_v53, %v2084_v0  ;;  %v1285_v61 = vmul.f32 %v1277_v57, %v2090_v43 }
0x17b8   :  { %v1286_v47 = vsel %vm97_vm1, %v1278_v46, 0.0  ;;  %v1287_v49 = vsel %vm97_vm1, %v1279_v42, 0.0  ;;  %v1289_v55 = vsel %vm97_vm1, %v1280_v44, 0.0  ;;  %v1291_v36 = vsel %vm97_vm1, %v1281_v45, 0.0 }
0x17b9   :  { %v1288_v51 = vadd.f32 %v1287_v49, %v1286_v47  ;;  %v1293_v27 = vsel %vm97_vm1, %v1282_v54, 0.0  ;;  %v1295_v62 = vsel %vm97_vm1, %v1283_v22, 0.0  ;;  %v1297_v39 = vsel %vm97_vm1, %v1284_v58, 0.0 }
0x17ba   :  { %v1299_v30 = vsel %vm97_vm1, %v1285_v61, 0.0 }
0x17bb   :  { %v1290_v56 = vadd.f32 %v1289_v55, %v1288_v51 }
0x17bd   :  { %v1292_v25 = vadd.f32 %v1291_v36, %v1290_v56 }
0x17bf   :  { %v1294_v60 = vadd.f32 %v1293_v27, %v1292_v25 }
0x17c1   :  { %v1296_v63 = vadd.f32 %v1295_v62, %v1294_v60 }
0x17c3   :  { %v1298_v52 = vadd.f32 %v1297_v39, %v1296_v63 }
0x17c5   :  { %v1300_v2 = vadd.f32 %v1299_v30, %v1298_v52 }
0x17c7   :  { %1301 = vst.msk [vmem:[#allocation12] sm:$0xff] %vm97_vm1, %v1300_v2 }
0x17c8   :  { %1768 = shalt.err (!%p1765_p8)
}
0x17c9   :  { %s1769_s28 = scalar_lea.hbm %s2129_s6, 128 }
0x17ca   :  { %p1770_p9 = scmp.ne.s32.totalorder %s2129_s6, %s1769_s28  ;;  %p1773_p10 = scmp.lt.u32.totalorder %s1769_s28, %s2129_s6 }
0x17cc   :  { %p1775_p11 = pnand %p1773_p10, %p1770_p9 }
0x17ce   :  { %1778 = shalt.err (!%p1775_p11)
}
0x17cf   :  { %1311 = dma.vmem_to_hbm [thread:$0]  %s1309_s23, 128, %s2129_s6, [#allocation6]  }
0x17d0   :  { %1785 = dma.done.wait [#allocation6], 128  }
0x17d1   :  { %1786 = vsyncadd [#allocation6], 4294967168 }
0x17d2   :  { %1315 = vsyncpa [#allocation5], 1 }
0x17d3   :  { %1316 = vsyncpa [#allocation8], 1 }
0x17d4   :  { %1317 = vsyncpa [#allocation11], 1 }
0x17d5   :  { %1318 = vsyncpa [#allocation6], 1 }

</bundles_post_ra>
